<compile_context>
chip_gen: v6e
topology: v6e:2x2x1
jax: 0.10.0
libtpu: 0.0.40
codegen_flags: <defaults>
</compile_context>

<pallas_src>
import jax
import jax.numpy as jnp
from jax.experimental import pallas as pl
from jax.experimental.pallas import tpu as pltpu


def _round_up(x, m):
    return ((x + m - 1) // m) * m


def _pick_tile_rows(hu, wu):
    """Output rows per grid step.

    Prefer an even TH dividing Hu with TH*wu a multiple of 256 lanes and >= 512 (fills the
    256-wide MXU N dim, long unmasked stores); otherwise any 128-lane multiple; otherwise
    fall back explicitly to TH = Hu (block == full extent: always legal, stores may be
    masked -- handled here instead of silently).
    """
    ok128 = None
    for th in (16, 32, 8, 4, 2):
        if hu % th:
            continue
        lanes = th * wu
        if lanes % 256 == 0 and lanes >= 512:
            return th
        if ok128 is None and lanes % 128 == 0:
            ok128 = th
    if ok128 is not None:
        return ok128
    return hu


def up_conv_forward(x_nchw, w_oihw, bias, gamma, beta, eps=1e-5):
    """up_conv forward.  x_nchw: (N, Cin, H, W) f32 -> (N, Cout, 2H, 2W) f32."""
    del bias  # exactly cancelled by train-mode BatchNorm mean subtraction (see header note)
    N, Cin, H, W = x_nchw.shape
    Cout = w_oihw.shape[0]
    Hu, Wu = 2 * H, 2 * W

    TH = _pick_tile_rows(Hu, Wu)      # output rows per grid step (even)
    T = Hu // TH
    NR = TH // 2 + 2                  # unique padded source rows touched by a tile
    Cinp = _round_up(Cin, 8)          # sublane-aligned channel count
    Wp = _round_up(W + 2, 128)        # lane-aligned padded source width
    NRC = NR * Cinp

    # ---- wrapper-side prep (small tensors only; upsampled image never hits HBM) --------
    # x: NCHW -> (N, H+2, Cinp, Wp) zero-padded at ORIGINAL resolution, flattened to
    # (N, (H+2)*Cinp, Wp) so each tile's source rows form one aligned sublane slice.
    x_prep = jnp.pad(jnp.transpose(x_nchw, (0, 2, 1, 3)),
                     ((0, 0), (1, 1), (0, Cinp - Cin), (1, Wp - W - 1)))
    x_prep = x_prep.astype(jnp.bfloat16).reshape(N, (H + 2) * Cinp, Wp)

    # width gather matrices: output col j, tap dx  <-  padded source col (j+dx+1)//2.
    src = jnp.arange(Wp)[:, None]
    j = jnp.arange(Wu)[None, :]
    gs = jnp.stack([(src == (j + dx + 1) // 2) for dx in range(3)],
                   axis=0).astype(jnp.bfloat16)                      # (3, Wp, Wu)

    # conv weight (Cout, Cin, 3, 3) -> (Cout, 9*Cinp), K ordered (dx, dy, cin)
    wpad = jnp.pad(w_oihw, ((0, 0), (0, Cinp - Cin), (0, 0), (0, 0)))
    wmat = jnp.transpose(wpad, (0, 3, 2, 1)).reshape(Cout, 9 * Cinp).astype(jnp.bfloat16)

    # ---- per-tile conv: de-duplicated gather + ONE fused weight matmul -----------------
    def _conv_tile(x_ref, gs_ref, w_ref):
        # aligned sublane slice holding the NR unique source rows of this tile
        i0 = pl.multiple_of(pl.program_id(1) * ((TH // 2) * Cinp), (TH // 2) * Cinp)
        xr = x_ref[0, pl.ds(i0, NRC), :]                              # (NR*Cinp, Wp) bf16
        # width gather: 3 matmuls per tile (one per dx) instead of 3*TH
        gat = [jnp.dot(xr, gs_ref[dx], preferred_element_type=jnp.float32)
               for dx in range(3)]                                    # 3 x (NR*Cinp, Wu) f32
        # assemble the full patch matrix for all TH output rows (static slices only;
        # source rows are re-used from the gathered result, never re-gathered)
        blocks = []
        for dx in range(3):
            g = gat[dx]
            for dy in range(3):
                cols = [g[((yl + dy + 1) // 2) * Cinp:((yl + dy + 1) // 2 + 1) * Cinp, :]
                        for yl in range(TH)]
                blocks.append(jnp.concatenate(cols, axis=1))          # (Cinp, TH*Wu)
        patches = jnp.concatenate(blocks, axis=0).astype(jnp.bfloat16)  # (9*Cinp, TH*Wu)
        # single fused weight contraction for the whole tile (f32 accumulate)
        return jnp.dot(w_ref[...], patches, preferred_element_type=jnp.float32)

    # ---- pass 1: conv + fused per-channel sum / sum-of-squares --------------------------
    # partial sums accumulate in the revisited per-image output block (t = reduction axis);
    # HBM writeback happens once per image.
    def stats_kernel(x_ref, gs_ref, w_ref, stats_ref):
        @pl.when(pl.program_id(1) == 0)
        def _():
            stats_ref[...] = jnp.zeros_like(stats_ref)
        c = _conv_tile(x_ref, gs_ref, w_ref)                          # (Cout, TH*Wu) f32
        s = jnp.sum(c, axis=1, keepdims=True)
        ss = jnp.sum(c * c, axis=1, keepdims=True)
        stats_ref[0, :, :] += jnp.concatenate([s, ss], axis=1)        # (Cout, 2)

    # ---- pass 2: recompute conv, BN scale/shift + ReLU, one unmasked block store --------
    def apply_kernel(x_ref, gs_ref, w_ref, scale_ref, shift_ref, o_ref):
        c = _conv_tile(x_ref, gs_ref, w_ref)
        o_ref[0, :, :] = jnp.maximum(c * scale_ref[...] + shift_ref[...], 0.0)

    # ---- specs / compiler params --------------------------------------------------------
    grid = (N, T)
    x_spec = pl.BlockSpec((1, (H + 2) * Cinp, Wp), lambda n, t: (n, 0, 0))  # revisited per n
    g_spec = pl.BlockSpec((3, Wp, Wu), lambda n, t: (0, 0, 0))
    w_spec = pl.BlockSpec((Cout, 9 * Cinp), lambda n, t: (0, 0))
    vec_spec = pl.BlockSpec((Cout, 1), lambda n, t: (0, 0))
    stats_spec = pl.BlockSpec((1, Cout, 2), lambda n, t: (n, 0, 0))
    out_spec = pl.BlockSpec((1, Cout, TH * Wu), lambda n, t: (n, 0, t))

    # explicit scoped-VMEM budget: above v5e's 16 MiB default, never above v7x's 64 MiB.
    vmem_est = ((H + 2) * Cinp * Wp * 2 + 3 * Wp * Wu * 2 + Cout * 9 * Cinp * 2
                + Cout * TH * Wu * 4 + 9 * Cinp * TH * Wu * 4 + 3 * NRC * Wu * 4)
    vmem_limit = int(min(64 * 1024 * 1024, max(32 * 1024 * 1024, 8 * vmem_est)))

    tile_flops = 2 * (3 * NRC * Wp * Wu + Cout * 9 * Cinp * TH * Wu)
    x_bytes = N * (H + 2) * Cinp * Wp * 2
    const_bytes = 3 * Wp * Wu * 2 + Cout * 9 * Cinp * 2
    stats_cost = pl.CostEstimate(flops=N * T * tile_flops, transcendentals=0,
                                 bytes_accessed=x_bytes + const_bytes + N * Cout * 2 * 4)
    apply_cost = pl.CostEstimate(flops=N * T * tile_flops, transcendentals=0,
                                 bytes_accessed=x_bytes + const_bytes
                                 + N * Cout * Hu * Wu * 4 + 2 * Cout * 4)

    stats = pl.pallas_call(
        stats_kernel,
        out_shape=jax.ShapeDtypeStruct((N, Cout, 2), jnp.float32),
        grid=grid,
        in_specs=[x_spec, g_spec, w_spec],
        out_specs=stats_spec,
        compiler_params=pltpu.CompilerParams(
            dimension_semantics=("parallel", "arbitrary"),
            vmem_limit_bytes=vmem_limit),
        cost_estimate=stats_cost,
    )(x_prep, gs, wmat)

    # tiny host-side combine -> train-mode (biased) batch statistics.
    # TODO(synk): E[x^2]-E[x]^2 in f32 cancels badly when |mean| >> std; use a shifted /
    # two-pass variance for such workloads.
    cnt = float(N * Hu * Wu)
    mean = jnp.sum(stats[:, :, 0], axis=0) / cnt
    var = jnp.maximum(jnp.sum(stats[:, :, 1], axis=0) / cnt - mean * mean, 0.0)
    scale = gamma * jax.lax.rsqrt(var + eps)
    shift = beta - mean * scale

    out_flat = pl.pallas_call(
        apply_kernel,
        out_shape=jax.ShapeDtypeStruct((N, Cout, Hu * Wu), jnp.float32),
        grid=grid,
        in_specs=[x_spec, g_spec, w_spec, vec_spec, vec_spec],
        out_specs=out_spec,
        compiler_params=pltpu.CompilerParams(
            dimension_semantics=("parallel", "parallel"),
            vmem_limit_bytes=vmem_limit),
        cost_estimate=apply_cost,
    )(x_prep, gs, wmat, scale.reshape(Cout, 1), shift.reshape(Cout, 1))

    # free contiguous reshape: flat NCHW -> (N, Cout, Hu, Wu)
    return out_flat.reshape(N, Cout, Hu, Wu)


def _reference(x, w, b, gamma, beta, eps=1e-5):
    """Pure-JAX/XLA reference of the PyTorch module (includes the conv bias)."""
    xu = jnp.repeat(jnp.repeat(x, 2, axis=2), 2, axis=3)
    conv = jax.lax.conv_general_dilated(
        xu, w, window_strides=(1, 1), padding=((1, 1), (1, 1)),
        dimension_numbers=("NCHW", "OIHW", "NCHW"),
        preferred_element_type=jnp.float32)
    conv = conv + b[None, :, None, None]
    mean = jnp.mean(conv, axis=(0, 2, 3), keepdims=True)
    var = jnp.var(conv, axis=(0, 2, 3), keepdims=True)   # biased, as PyTorch BN (train)
    y = (conv - mean) * jax.lax.rsqrt(var + eps)
    y = y * gamma[None, :, None, None] + beta[None, :, None, None]
    return jnp.maximum(y, 0.0)


if __name__ == "__main__":
    key = jax.random.PRNGKey(0)
    k_x, k_w, k_b = jax.random.split(key, 3)

    N, CH_IN, CH_OUT, H, W = 2, 4, 8, 16, 16

    x = jax.random.normal(k_x, (N, CH_IN, H, W), dtype=jnp.float32)
    w_conv = jax.random.normal(k_w, (CH_OUT, CH_IN, 3, 3), dtype=jnp.float32) * 0.1
    b_conv = jax.random.normal(k_b, (CH_OUT,), dtype=jnp.float32) * 0.1
    gamma = jnp.ones((CH_OUT,), dtype=jnp.float32)   # BatchNorm2d default init
    beta = jnp.zeros((CH_OUT,), dtype=jnp.float32)

    y = up_conv_forward(x, w_conv, b_conv, gamma, beta)
    y = jax.block_until_ready(y)

    assert y.shape == (N, CH_OUT, 2 * H, 2 * W), y.shape
    assert bool(jnp.all(y >= 0.0))                   # ReLU output is non-negative

    # numerical check vs the f32 XLA reference (tolerance covers bf16 input rounding)
    y_ref = _reference(x, w_conv, b_conv, gamma, beta)
    max_err = float(jnp.max(jnp.abs(y - y_ref)))
    assert max_err < 1e-1, max_err

    print("KERNEL_OK")
</pallas_src>

<mosaic_0001>
module attributes {stable_mosaic.version = 11 : i64} {
  func.func @stats_kernel(%arg0: i32, %arg1: i32, %arg2: memref<1x144x128xbf16, #tpu.memory_space<vmem>>, %arg3: memref<3x128x32xbf16, #tpu.memory_space<vmem>>, %arg4: memref<8x72xbf16, #tpu.memory_space<vmem>>, %arg5: memref<1x8x2xf32, #tpu.memory_space<vmem>>) attributes {dimension_semantics = [#tpu.dimension_semantics<parallel>, #tpu.dimension_semantics<arbitrary>], iteration_bounds = array<i64: 2, 2>, scalar_prefetch = 0 : i64, scratch_operands = 0 : i64, tpu.core_type = #tpu.core_type<tc>, window_params = [{transform_indices = @transform_0, window_bounds = array<i64: 1, 144, 128>}, {pipeline_mode = #tpu.pipeline_mode<synchronous>, transform_indices = @transform_1, window_bounds = array<i64: 3, 128, 32>}, {pipeline_mode = #tpu.pipeline_mode<synchronous>, transform_indices = @transform_2, window_bounds = array<i64: 8, 72>}, {transform_indices = @transform_3, window_bounds = array<i64: 1, 8, 2>}]} {
    %c0_i32 = arith.constant 0 : i32
    %0 = arith.cmpi eq, %arg1, %c0_i32 : i32
    %1 = arith.extui %0 : i1 to i32
    %c0_i32_0 = arith.constant 0 : i32
    %2 = arith.cmpi ne, %1, %c0_i32_0 : i32
    scf.if %2 {
      %cst_22 = arith.constant 0.000000e+00 : f32
      %186 = vector.broadcast %cst_22 : f32 to vector<1x8x2xf32>
      %c0_23 = arith.constant 0 : index
      %c0_24 = arith.constant 0 : index
      %c0_25 = arith.constant 0 : index
      %187 = vector.load %arg5[%c0_23, %c0_24, %c0_25] : memref<1x8x2xf32, #tpu.memory_space<vmem>>, vector<1x8x2xf32>
      tpu.vector_store %arg5[%c0_23, %c0_24, %c0_25], %186 {strides = array<i32>} : memref<1x8x2xf32, #tpu.memory_space<vmem>>, vector<1x8x2xf32>,
    } else {
    }
    %c64_i32 = arith.constant 64 : i32
    %3 = arith.muli %arg1, %c64_i32 : i32
    %4 = tpu.assume_multiple %3, 64 : i32
    %c0 = arith.constant 0 : index
    %5 = arith.index_cast %4 : i32 to index
    %c0_1 = arith.constant 0 : index
    %6 = vector.load %arg2[%c0, %5, %c0_1] : memref<1x144x128xbf16, #tpu.memory_space<vmem>>, vector<1x80x128xbf16>
    %7 = vector.shape_cast %6 : vector<1x80x128xbf16> to vector<80x128xbf16>
    %c0_2 = arith.constant 0 : index
    %c0_3 = arith.constant 0 : index
    %c0_4 = arith.constant 0 : index
    %8 = vector.load %arg3[%c0_2, %c0_3, %c0_4] : memref<3x128x32xbf16, #tpu.memory_space<vmem>>, vector<1x128x32xbf16>
    %9 = vector.shape_cast %8 : vector<1x128x32xbf16> to vector<128x32xbf16>
    %cst = arith.constant dense<0.000000e+00> : vector<80x32xf32>
    %10 = tpu.matmul %7, %9, %cst {dimension_numbers = #tpu.dot_dimension_numbers<[1], [0], [0], [1], [0, 0, 1, 1], [], []>} : vector<80x128xbf16>, vector<128x32xbf16>, vector<80x32xf32> -> vector<80x32xf32>
    %c1 = arith.constant 1 : index
    %c0_5 = arith.constant 0 : index
    %c0_6 = arith.constant 0 : index
    %11 = vector.load %arg3[%c1, %c0_5, %c0_6] : memref<3x128x32xbf16, #tpu.memory_space<vmem>>, vector<1x128x32xbf16>
    %12 = vector.shape_cast %11 : vector<1x128x32xbf16> to vector<128x32xbf16>
    %cst_7 = arith.constant dense<0.000000e+00> : vector<80x32xf32>
    %13 = tpu.matmul %7, %12, %cst_7 {dimension_numbers = #tpu.dot_dimension_numbers<[1], [0], [0], [1], [0, 0, 1, 1], [], []>} : vector<80x128xbf16>, vector<128x32xbf16>, vector<80x32xf32> -> vector<80x32xf32>
    %c2 = arith.constant 2 : index
    %c0_8 = arith.constant 0 : index
    %c0_9 = arith.constant 0 : index
    %14 = vector.load %arg3[%c2, %c0_8, %c0_9] : memref<3x128x32xbf16, #tpu.memory_space<vmem>>, vector<1x128x32xbf16>
    %15 = vector.shape_cast %14 : vector<1x128x32xbf16> to vector<128x32xbf16>
    %cst_10 = arith.constant dense<0.000000e+00> : vector<80x32xf32>
    %16 = tpu.matmul %7, %15, %cst_10 {dimension_numbers = #tpu.dot_dimension_numbers<[1], [0], [0], [1], [0, 0, 1, 1], [], []>} : vector<80x128xbf16>, vector<128x32xbf16>, vector<80x32xf32> -> vector<80x32xf32>
    %17 = vector.extract_strided_slice %10 {offsets = [0, 0], sizes = [8, 32], strides = [1, 1]} : vector<80x32xf32> to vector<8x32xf32>
    %18 = vector.extract_strided_slice %10 {offsets = [8, 0], sizes = [8, 32], strides = [1, 1]} : vector<80x32xf32> to vector<8x32xf32>
    %19 = vector.extract_strided_slice %10 {offsets = [8, 0], sizes = [8, 32], strides = [1, 1]} : vector<80x32xf32> to vector<8x32xf32>
    %20 = vector.extract_strided_slice %10 {offsets = [16, 0], sizes = [8, 32], strides = [1, 1]} : vector<80x32xf32> to vector<8x32xf32>
    %21 = vector.extract_strided_slice %10 {offsets = [16, 0], sizes = [8, 32], strides = [1, 1]} : vector<80x32xf32> to vector<8x32xf32>
    %22 = vector.extract_strided_slice %10 {offsets = [24, 0], sizes = [8, 32], strides = [1, 1]} : vector<80x32xf32> to vector<8x32xf32>
    %23 = vector.extract_strided_slice %10 {offsets = [24, 0], sizes = [8, 32], strides = [1, 1]} : vector<80x32xf32> to vector<8x32xf32>
    %24 = vector.extract_strided_slice %10 {offsets = [32, 0], sizes = [8, 32], strides = [1, 1]} : vector<80x32xf32> to vector<8x32xf32>
    %25 = vector.extract_strided_slice %10 {offsets = [32, 0], sizes = [8, 32], strides = [1, 1]} : vector<80x32xf32> to vector<8x32xf32>
    %26 = vector.extract_strided_slice %10 {offsets = [40, 0], sizes = [8, 32], strides = [1, 1]} : vector<80x32xf32> to vector<8x32xf32>
    %27 = vector.extract_strided_slice %10 {offsets = [40, 0], sizes = [8, 32], strides = [1, 1]} : vector<80x32xf32> to vector<8x32xf32>
    %28 = vector.extract_strided_slice %10 {offsets = [48, 0], sizes = [8, 32], strides = [1, 1]} : vector<80x32xf32> to vector<8x32xf32>
    %29 = vector.extract_strided_slice %10 {offsets = [48, 0], sizes = [8, 32], strides = [1, 1]} : vector<80x32xf32> to vector<8x32xf32>
    %30 = vector.extract_strided_slice %10 {offsets = [56, 0], sizes = [8, 32], strides = [1, 1]} : vector<80x32xf32> to vector<8x32xf32>
    %31 = vector.extract_strided_slice %10 {offsets = [56, 0], sizes = [8, 32], strides = [1, 1]} : vector<80x32xf32> to vector<8x32xf32>
    %32 = vector.extract_strided_slice %10 {offsets = [64, 0], sizes = [8, 32], strides = [1, 1]} : vector<80x32xf32> to vector<8x32xf32>
    %33 = tpu.concatenate %17, %18, %19, %20, %21, %22, %23, %24, %25, %26, %27, %28, %29, %30, %31, %32 in 1 : vector<8x32xf32>, vector<8x32xf32>, vector<8x32xf32>, vector<8x32xf32>, vector<8x32xf32>, vector<8x32xf32>, vector<8x32xf32>, vector<8x32xf32>, vector<8x32xf32>, vector<8x32xf32>, vector<8x32xf32>, vector<8x32xf32>, vector<8x32xf32>, vector<8x32xf32>, vector<8x32xf32>, vector<8x32xf32> -> vector<8x512xf32>
    %34 = vector.extract_strided_slice %10 {offsets = [8, 0], sizes = [8, 32], strides = [1, 1]} : vector<80x32xf32> to vector<8x32xf32>
    %35 = vector.extract_strided_slice %10 {offsets = [8, 0], sizes = [8, 32], strides = [1, 1]} : vector<80x32xf32> to vector<8x32xf32>
    %36 = vector.extract_strided_slice %10 {offsets = [16, 0], sizes = [8, 32], strides = [1, 1]} : vector<80x32xf32> to vector<8x32xf32>
    %37 = vector.extract_strided_slice %10 {offsets = [16, 0], sizes = [8, 32], strides = [1, 1]} : vector<80x32xf32> to vector<8x32xf32>
    %38 = vector.extract_strided_slice %10 {offsets = [24, 0], sizes = [8, 32], strides = [1, 1]} : vector<80x32xf32> to vector<8x32xf32>
    %39 = vector.extract_strided_slice %10 {offsets = [24, 0], sizes = [8, 32], strides = [1, 1]} : vector<80x32xf32> to vector<8x32xf32>
    %40 = vector.extract_strided_slice %10 {offsets = [32, 0], sizes = [8, 32], strides = [1, 1]} : vector<80x32xf32> to vector<8x32xf32>
    %41 = vector.extract_strided_slice %10 {offsets = [32, 0], sizes = [8, 32], strides = [1, 1]} : vector<80x32xf32> to vector<8x32xf32>
    %42 = vector.extract_strided_slice %10 {offsets = [40, 0], sizes = [8, 32], strides = [1, 1]} : vector<80x32xf32> to vector<8x32xf32>
    %43 = vector.extract_strided_slice %10 {offsets = [40, 0], sizes = [8, 32], strides = [1, 1]} : vector<80x32xf32> to vector<8x32xf32>
    %44 = vector.extract_strided_slice %10 {offsets = [48, 0], sizes = [8, 32], strides = [1, 1]} : vector<80x32xf32> to vector<8x32xf32>
    %45 = vector.extract_strided_slice %10 {offsets = [48, 0], sizes = [8, 32], strides = [1, 1]} : vector<80x32xf32> to vector<8x32xf32>
    %46 = vector.extract_strided_slice %10 {offsets = [56, 0], sizes = [8, 32], strides = [1, 1]} : vector<80x32xf32> to vector<8x32xf32>
    %47 = vector.extract_strided_slice %10 {offsets = [56, 0], sizes = [8, 32], strides = [1, 1]} : vector<80x32xf32> to vector<8x32xf32>
    %48 = vector.extract_strided_slice %10 {offsets = [64, 0], sizes = [8, 32], strides = [1, 1]} : vector<80x32xf32> to vector<8x32xf32>
    %49 = vector.extract_strided_slice %10 {offsets = [64, 0], sizes = [8, 32], strides = [1, 1]} : vector<80x32xf32> to vector<8x32xf32>
    %50 = tpu.concatenate %34, %35, %36, %37, %38, %39, %40, %41, %42, %43, %44, %45, %46, %47, %48, %49 in 1 : vector<8x32xf32>, vector<8x32xf32>, vector<8x32xf32>, vector<8x32xf32>, vector<8x32xf32>, vector<8x32xf32>, vector<8x32xf32>, vector<8x32xf32>, vector<8x32xf32>, vector<8x32xf32>, vector<8x32xf32>, vector<8x32xf32>, vector<8x32xf32>, vector<8x32xf32>, vector<8x32xf32>, vector<8x32xf32> -> vector<8x512xf32>
    %51 = vector.extract_strided_slice %10 {offsets = [8, 0], sizes = [8, 32], strides = [1, 1]} : vector<80x32xf32> to vector<8x32xf32>
    %52 = vector.extract_strided_slice %10 {offsets = [16, 0], sizes = [8, 32], strides = [1, 1]} : vector<80x32xf32> to vector<8x32xf32>
    %53 = vector.extract_strided_slice %10 {offsets = [16, 0], sizes = [8, 32], strides = [1, 1]} : vector<80x32xf32> to vector<8x32xf32>
    %54 = vector.extract_strided_slice %10 {offsets = [24, 0], sizes = [8, 32], strides = [1, 1]} : vector<80x32xf32> to vector<8x32xf32>
    %55 = vector.extract_strided_slice %10 {offsets = [24, 0], sizes = [8, 32], strides = [1, 1]} : vector<80x32xf32> to vector<8x32xf32>
    %56 = vector.extract_strided_slice %10 {offsets = [32, 0], sizes = [8, 32], strides = [1, 1]} : vector<80x32xf32> to vector<8x32xf32>
    %57 = vector.extract_strided_slice %10 {offsets = [32, 0], sizes = [8, 32], strides = [1, 1]} : vector<80x32xf32> to vector<8x32xf32>
    %58 = vector.extract_strided_slice %10 {offsets = [40, 0], sizes = [8, 32], strides = [1, 1]} : vector<80x32xf32> to vector<8x32xf32>
    %59 = vector.extract_strided_slice %10 {offsets = [40, 0], sizes = [8, 32], strides = [1, 1]} : vector<80x32xf32> to vector<8x32xf32>
    %60 = vector.extract_strided_slice %10 {offsets = [48, 0], sizes = [8, 32], strides = [1, 1]} : vector<80x32xf32> to vector<8x32xf32>
    %61 = vector.extract_strided_slice %10 {offsets = [48, 0], sizes = [8, 32], strides = [1, 1]} : vector<80x32xf32> to vector<8x32xf32>
    %62 = vector.extract_strided_slice %10 {offsets = [56, 0], sizes = [8, 32], strides = [1, 1]} : vector<80x32xf32> to vector<8x32xf32>
    %63 = vector.extract_strided_slice %10 {offsets = [56, 0], sizes = [8, 32], strides = [1, 1]} : vector<80x32xf32> to vector<8x32xf32>
    %64 = vector.extract_strided_slice %10 {offsets = [64, 0], sizes = [8, 32], strides = [1, 1]} : vector<80x32xf32> to vector<8x32xf32>
    %65 = vector.extract_strided_slice %10 {offsets = [64, 0], sizes = [8, 32], strides = [1, 1]} : vector<80x32xf32> to vector<8x32xf32>
    %66 = vector.extract_strided_slice %10 {offsets = [72, 0], sizes = [8, 32], strides = [1, 1]} : vector<80x32xf32> to vector<8x32xf32>
    %67 = tpu.concatenate %51, %52, %53, %54, %55, %56, %57, %58, %59, %60, %61, %62, %63, %64, %65, %66 in 1 : vector<8x32xf32>, vector<8x32xf32>, vector<8x32xf32>, vector<8x32xf32>, vector<8x32xf32>, vector<8x32xf32>, vector<8x32xf32>, vector<8x32xf32>, vector<8x32xf32>, vector<8x32xf32>, vector<8x32xf32>, vector<8x32xf32>, vector<8x32xf32>, vector<8x32xf32>, vector<8x32xf32>, vector<8x32xf32> -> vector<8x512xf32>
    %68 = vector.extract_strided_slice %13 {offsets = [0, 0], sizes = [8, 32], strides = [1, 1]} : vector<80x32xf32> to vector<8x32xf32>
    %69 = vector.extract_strided_slice %13 {offsets = [8, 0], sizes = [8, 32], strides = [1, 1]} : vector<80x32xf32> to vector<8x32xf32>
    %70 = vector.extract_strided_slice %13 {offsets = [8, 0], sizes = [8, 32], strides = [1, 1]} : vector<80x32xf32> to vector<8x32xf32>
    %71 = vector.extract_strided_slice %13 {offsets = [16, 0], sizes = [8, 32], strides = [1, 1]} : vector<80x32xf32> to vector<8x32xf32>
    %72 = vector.extract_strided_slice %13 {offsets = [16, 0], sizes = [8, 32], strides = [1, 1]} : vector<80x32xf32> to vector<8x32xf32>
    %73 = vector.extract_strided_slice %13 {offsets = [24, 0], sizes = [8, 32], strides = [1, 1]} : vector<80x32xf32> to vector<8x32xf32>
    %74 = vector.extract_strided_slice %13 {offsets = [24, 0], sizes = [8, 32], strides = [1, 1]} : vector<80x32xf32> to vector<8x32xf32>
    %75 = vector.extract_strided_slice %13 {offsets = [32, 0], sizes = [8, 32], strides = [1, 1]} : vector<80x32xf32> to vector<8x32xf32>
    %76 = vector.extract_strided_slice %13 {offsets = [32, 0], sizes = [8, 32], strides = [1, 1]} : vector<80x32xf32> to vector<8x32xf32>
    %77 = vector.extract_strided_slice %13 {offsets = [40, 0], sizes = [8, 32], strides = [1, 1]} : vector<80x32xf32> to vector<8x32xf32>
    %78 = vector.extract_strided_slice %13 {offsets = [40, 0], sizes = [8, 32], strides = [1, 1]} : vector<80x32xf32> to vector<8x32xf32>
    %79 = vector.extract_strided_slice %13 {offsets = [48, 0], sizes = [8, 32], strides = [1, 1]} : vector<80x32xf32> to vector<8x32xf32>
    %80 = vector.extract_strided_slice %13 {offsets = [48, 0], sizes = [8, 32], strides = [1, 1]} : vector<80x32xf32> to vector<8x32xf32>
    %81 = vector.extract_strided_slice %13 {offsets = [56, 0], sizes = [8, 32], strides = [1, 1]} : vector<80x32xf32> to vector<8x32xf32>
    %82 = vector.extract_strided_slice %13 {offsets = [56, 0], sizes = [8, 32], strides = [1, 1]} : vector<80x32xf32> to vector<8x32xf32>
    %83 = vector.extract_strided_slice %13 {offsets = [64, 0], sizes = [8, 32], strides = [1, 1]} : vector<80x32xf32> to vector<8x32xf32>
    %84 = tpu.concatenate %68, %69, %70, %71, %72, %73, %74, %75, %76, %77, %78, %79, %80, %81, %82, %83 in 1 : vector<8x32xf32>, vector<8x32xf32>, vector<8x32xf32>, vector<8x32xf32>, vector<8x32xf32>, vector<8x32xf32>, vector<8x32xf32>, vector<8x32xf32>, vector<8x32xf32>, vector<8x32xf32>, vector<8x32xf32>, vector<8x32xf32>, vector<8x32xf32>, vector<8x32xf32>, vector<8x32xf32>, vector<8x32xf32> -> vector<8x512xf32>
    %85 = vector.extract_strided_slice %13 {offsets = [8, 0], sizes = [8, 32], strides = [1, 1]} : vector<80x32xf32> to vector<8x32xf32>
    %86 = vector.extract_strided_slice %13 {offsets = [8, 0], sizes = [8, 32], strides = [1, 1]} : vector<80x32xf32> to vector<8x32xf32>
    %87 = vector.extract_strided_slice %13 {offsets = [16, 0], sizes = [8, 32], strides = [1, 1]} : vector<80x32xf32> to vector<8x32xf32>
    %88 = vector.extract_strided_slice %13 {offsets = [16, 0], sizes = [8, 32], strides = [1, 1]} : vector<80x32xf32> to vector<8x32xf32>
    %89 = vector.extract_strided_slice %13 {offsets = [24, 0], sizes = [8, 32], strides = [1, 1]} : vector<80x32xf32> to vector<8x32xf32>
    %90 = vector.extract_strided_slice %13 {offsets = [24, 0], sizes = [8, 32], strides = [1, 1]} : vector<80x32xf32> to vector<8x32xf32>
    %91 = vector.extract_strided_slice %13 {offsets = [32, 0], sizes = [8, 32], strides = [1, 1]} : vector<80x32xf32> to vector<8x32xf32>
    %92 = vector.extract_strided_slice %13 {offsets = [32, 0], sizes = [8, 32], strides = [1, 1]} : vector<80x32xf32> to vector<8x32xf32>
    %93 = vector.extract_strided_slice %13 {offsets = [40, 0], sizes = [8, 32], strides = [1, 1]} : vector<80x32xf32> to vector<8x32xf32>
    %94 = vector.extract_strided_slice %13 {offsets = [40, 0], sizes = [8, 32], strides = [1, 1]} : vector<80x32xf32> to vector<8x32xf32>
    %95 = vector.extract_strided_slice %13 {offsets = [48, 0], sizes = [8, 32], strides = [1, 1]} : vector<80x32xf32> to vector<8x32xf32>
    %96 = vector.extract_strided_slice %13 {offsets = [48, 0], sizes = [8, 32], strides = [1, 1]} : vector<80x32xf32> to vector<8x32xf32>
    %97 = vector.extract_strided_slice %13 {offsets = [56, 0], sizes = [8, 32], strides = [1, 1]} : vector<80x32xf32> to vector<8x32xf32>
    %98 = vector.extract_strided_slice %13 {offsets = [56, 0], sizes = [8, 32], strides = [1, 1]} : vector<80x32xf32> to vector<8x32xf32>
    %99 = vector.extract_strided_slice %13 {offsets = [64, 0], sizes = [8, 32], strides = [1, 1]} : vector<80x32xf32> to vector<8x32xf32>
    %100 = vector.extract_strided_slice %13 {offsets = [64, 0], sizes = [8, 32], strides = [1, 1]} : vector<80x32xf32> to vector<8x32xf32>
    %101 = tpu.concatenate %85, %86, %87, %88, %89, %90, %91, %92, %93, %94, %95, %96, %97, %98, %99, %100 in 1 : vector<8x32xf32>, vector<8x32xf32>, vector<8x32xf32>, vector<8x32xf32>, vector<8x32xf32>, vector<8x32xf32>, vector<8x32xf32>, vector<8x32xf32>, vector<8x32xf32>, vector<8x32xf32>, vector<8x32xf32>, vector<8x32xf32>, vector<8x32xf32>, vector<8x32xf32>, vector<8x32xf32>, vector<8x32xf32> -> vector<8x512xf32>
    %102 = vector.extract_strided_slice %13 {offsets = [8, 0], sizes = [8, 32], strides = [1, 1]} : vector<80x32xf32> to vector<8x32xf32>
    %103 = vector.extract_strided_slice %13 {offsets = [16, 0], sizes = [8, 32], strides = [1, 1]} : vector<80x32xf32> to vector<8x32xf32>
    %104 = vector.extract_strided_slice %13 {offsets = [16, 0], sizes = [8, 32], strides = [1, 1]} : vector<80x32xf32> to vector<8x32xf32>
    %105 = vector.extract_strided_slice %13 {offsets = [24, 0], sizes = [8, 32], strides = [1, 1]} : vector<80x32xf32> to vector<8x32xf32>
    %106 = vector.extract_strided_slice %13 {offsets = [24, 0], sizes = [8, 32], strides = [1, 1]} : vector<80x32xf32> to vector<8x32xf32>
    %107 = vector.extract_strided_slice %13 {offsets = [32, 0], sizes = [8, 32], strides = [1, 1]} : vector<80x32xf32> to vector<8x32xf32>
    %108 = vector.extract_strided_slice %13 {offsets = [32, 0], sizes = [8, 32], strides = [1, 1]} : vector<80x32xf32> to vector<8x32xf32>
    %109 = vector.extract_strided_slice %13 {offsets = [40, 0], sizes = [8, 32], strides = [1, 1]} : vector<80x32xf32> to vector<8x32xf32>
    %110 = vector.extract_strided_slice %13 {offsets = [40, 0], sizes = [8, 32], strides = [1, 1]} : vector<80x32xf32> to vector<8x32xf32>
    %111 = vector.extract_strided_slice %13 {offsets = [48, 0], sizes = [8, 32], strides = [1, 1]} : vector<80x32xf32> to vector<8x32xf32>
    %112 = vector.extract_strided_slice %13 {offsets = [48, 0], sizes = [8, 32], strides = [1, 1]} : vector<80x32xf32> to vector<8x32xf32>
    %113 = vector.extract_strided_slice %13 {offsets = [56, 0], sizes = [8, 32], strides = [1, 1]} : vector<80x32xf32> to vector<8x32xf32>
    %114 = vector.extract_strided_slice %13 {offsets = [56, 0], sizes = [8, 32], strides = [1, 1]} : vector<80x32xf32> to vector<8x32xf32>
    %115 = vector.extract_strided_slice %13 {offsets = [64, 0], sizes = [8, 32], strides = [1, 1]} : vector<80x32xf32> to vector<8x32xf32>
    %116 = vector.extract_strided_slice %13 {offsets = [64, 0], sizes = [8, 32], strides = [1, 1]} : vector<80x32xf32> to vector<8x32xf32>
    %117 = vector.extract_strided_slice %13 {offsets = [72, 0], sizes = [8, 32], strides = [1, 1]} : vector<80x32xf32> to vector<8x32xf32>
    %118 = tpu.concatenate %102, %103, %104, %105, %106, %107, %108, %109, %110, %111, %112, %113, %114, %115, %116, %117 in 1 : vector<8x32xf32>, vector<8x32xf32>, vector<8x32xf32>, vector<8x32xf32>, vector<8x32xf32>, vector<8x32xf32>, vector<8x32xf32>, vector<8x32xf32>, vector<8x32xf32>, vector<8x32xf32>, vector<8x32xf32>, vector<8x32xf32>, vector<8x32xf32>, vector<8x32xf32>, vector<8x32xf32>, vector<8x32xf32> -> vector<8x512xf32>
    %119 = vector.extract_strided_slice %16 {offsets = [0, 0], sizes = [8, 32], strides = [1, 1]} : vector<80x32xf32> to vector<8x32xf32>
    %120 = vector.extract_strided_slice %16 {offsets = [8, 0], sizes = [8, 32], strides = [1, 1]} : vector<80x32xf32> to vector<8x32xf32>
    %121 = vector.extract_strided_slice %16 {offsets = [8, 0], sizes = [8, 32], strides = [1, 1]} : vector<80x32xf32> to vector<8x32xf32>
    %122 = vector.extract_strided_slice %16 {offsets = [16, 0], sizes = [8, 32], strides = [1, 1]} : vector<80x32xf32> to vector<8x32xf32>
    %123 = vector.extract_strided_slice %16 {offsets = [16, 0], sizes = [8, 32], strides = [1, 1]} : vector<80x32xf32> to vector<8x32xf32>
    %124 = vector.extract_strided_slice %16 {offsets = [24, 0], sizes = [8, 32], strides = [1, 1]} : vector<80x32xf32> to vector<8x32xf32>
    %125 = vector.extract_strided_slice %16 {offsets = [24, 0], sizes = [8, 32], strides = [1, 1]} : vector<80x32xf32> to vector<8x32xf32>
    %126 = vector.extract_strided_slice %16 {offsets = [32, 0], sizes = [8, 32], strides = [1, 1]} : vector<80x32xf32> to vector<8x32xf32>
    %127 = vector.extract_strided_slice %16 {offsets = [32, 0], sizes = [8, 32], strides = [1, 1]} : vector<80x32xf32> to vector<8x32xf32>
    %128 = vector.extract_strided_slice %16 {offsets = [40, 0], sizes = [8, 32], strides = [1, 1]} : vector<80x32xf32> to vector<8x32xf32>
    %129 = vector.extract_strided_slice %16 {offsets = [40, 0], sizes = [8, 32], strides = [1, 1]} : vector<80x32xf32> to vector<8x32xf32>
    %130 = vector.extract_strided_slice %16 {offsets = [48, 0], sizes = [8, 32], strides = [1, 1]} : vector<80x32xf32> to vector<8x32xf32>
    %131 = vector.extract_strided_slice %16 {offsets = [48, 0], sizes = [8, 32], strides = [1, 1]} : vector<80x32xf32> to vector<8x32xf32>
    %132 = vector.extract_strided_slice %16 {offsets = [56, 0], sizes = [8, 32], strides = [1, 1]} : vector<80x32xf32> to vector<8x32xf32>
    %133 = vector.extract_strided_slice %16 {offsets = [56, 0], sizes = [8, 32], strides = [1, 1]} : vector<80x32xf32> to vector<8x32xf32>
    %134 = vector.extract_strided_slice %16 {offsets = [64, 0], sizes = [8, 32], strides = [1, 1]} : vector<80x32xf32> to vector<8x32xf32>
    %135 = tpu.concatenate %119, %120, %121, %122, %123, %124, %125, %126, %127, %128, %129, %130, %131, %132, %133, %134 in 1 : vector<8x32xf32>, vector<8x32xf32>, vector<8x32xf32>, vector<8x32xf32>, vector<8x32xf32>, vector<8x32xf32>, vector<8x32xf32>, vector<8x32xf32>, vector<8x32xf32>, vector<8x32xf32>, vector<8x32xf32>, vector<8x32xf32>, vector<8x32xf32>, vector<8x32xf32>, vector<8x32xf32>, vector<8x32xf32> -> vector<8x512xf32>
    %136 = vector.extract_strided_slice %16 {offsets = [8, 0], sizes = [8, 32], strides = [1, 1]} : vector<80x32xf32> to vector<8x32xf32>
    %137 = vector.extract_strided_slice %16 {offsets = [8, 0], sizes = [8, 32], strides = [1, 1]} : vector<80x32xf32> to vector<8x32xf32>
    %138 = vector.extract_strided_slice %16 {offsets = [16, 0], sizes = [8, 32], strides = [1, 1]} : vector<80x32xf32> to vector<8x32xf32>
    %139 = vector.extract_strided_slice %16 {offsets = [16, 0], sizes = [8, 32], strides = [1, 1]} : vector<80x32xf32> to vector<8x32xf32>
    %140 = vector.extract_strided_slice %16 {offsets = [24, 0], sizes = [8, 32], strides = [1, 1]} : vector<80x32xf32> to vector<8x32xf32>
    %141 = vector.extract_strided_slice %16 {offsets = [24, 0], sizes = [8, 32], strides = [1, 1]} : vector<80x32xf32> to vector<8x32xf32>
    %142 = vector.extract_strided_slice %16 {offsets = [32, 0], sizes = [8, 32], strides = [1, 1]} : vector<80x32xf32> to vector<8x32xf32>
    %143 = vector.extract_strided_slice %16 {offsets = [32, 0], sizes = [8, 32], strides = [1, 1]} : vector<80x32xf32> to vector<8x32xf32>
    %144 = vector.extract_strided_slice %16 {offsets = [40, 0], sizes = [8, 32], strides = [1, 1]} : vector<80x32xf32> to vector<8x32xf32>
    %145 = vector.extract_strided_slice %16 {offsets = [40, 0], sizes = [8, 32], strides = [1, 1]} : vector<80x32xf32> to vector<8x32xf32>
    %146 = vector.extract_strided_slice %16 {offsets = [48, 0], sizes = [8, 32], strides = [1, 1]} : vector<80x32xf32> to vector<8x32xf32>
    %147 = vector.extract_strided_slice %16 {offsets = [48, 0], sizes = [8, 32], strides = [1, 1]} : vector<80x32xf32> to vector<8x32xf32>
    %148 = vector.extract_strided_slice %16 {offsets = [56, 0], sizes = [8, 32], strides = [1, 1]} : vector<80x32xf32> to vector<8x32xf32>
    %149 = vector.extract_strided_slice %16 {offsets = [56, 0], sizes = [8, 32], strides = [1, 1]} : vector<80x32xf32> to vector<8x32xf32>
    %150 = vector.extract_strided_slice %16 {offsets = [64, 0], sizes = [8, 32], strides = [1, 1]} : vector<80x32xf32> to vector<8x32xf32>
    %151 = vector.extract_strided_slice %16 {offsets = [64, 0], sizes = [8, 32], strides = [1, 1]} : vector<80x32xf32> to vector<8x32xf32>
    %152 = tpu.concatenate %136, %137, %138, %139, %140, %141, %142, %143, %144, %145, %146, %147, %148, %149, %150, %151 in 1 : vector<8x32xf32>, vector<8x32xf32>, vector<8x32xf32>, vector<8x32xf32>, vector<8x32xf32>, vector<8x32xf32>, vector<8x32xf32>, vector<8x32xf32>, vector<8x32xf32>, vector<8x32xf32>, vector<8x32xf32>, vector<8x32xf32>, vector<8x32xf32>, vector<8x32xf32>, vector<8x32xf32>, vector<8x32xf32> -> vector<8x512xf32>
    %153 = vector.extract_strided_slice %16 {offsets = [8, 0], sizes = [8, 32], strides = [1, 1]} : vector<80x32xf32> to vector<8x32xf32>
    %154 = vector.extract_strided_slice %16 {offsets = [16, 0], sizes = [8, 32], strides = [1, 1]} : vector<80x32xf32> to vector<8x32xf32>
    %155 = vector.extract_strided_slice %16 {offsets = [16, 0], sizes = [8, 32], strides = [1, 1]} : vector<80x32xf32> to vector<8x32xf32>
    %156 = vector.extract_strided_slice %16 {offsets = [24, 0], sizes = [8, 32], strides = [1, 1]} : vector<80x32xf32> to vector<8x32xf32>
    %157 = vector.extract_strided_slice %16 {offsets = [24, 0], sizes = [8, 32], strides = [1, 1]} : vector<80x32xf32> to vector<8x32xf32>
    %158 = vector.extract_strided_slice %16 {offsets = [32, 0], sizes = [8, 32], strides = [1, 1]} : vector<80x32xf32> to vector<8x32xf32>
    %159 = vector.extract_strided_slice %16 {offsets = [32, 0], sizes = [8, 32], strides = [1, 1]} : vector<80x32xf32> to vector<8x32xf32>
    %160 = vector.extract_strided_slice %16 {offsets = [40, 0], sizes = [8, 32], strides = [1, 1]} : vector<80x32xf32> to vector<8x32xf32>
    %161 = vector.extract_strided_slice %16 {offsets = [40, 0], sizes = [8, 32], strides = [1, 1]} : vector<80x32xf32> to vector<8x32xf32>
    %162 = vector.extract_strided_slice %16 {offsets = [48, 0], sizes = [8, 32], strides = [1, 1]} : vector<80x32xf32> to vector<8x32xf32>
    %163 = vector.extract_strided_slice %16 {offsets = [48, 0], sizes = [8, 32], strides = [1, 1]} : vector<80x32xf32> to vector<8x32xf32>
    %164 = vector.extract_strided_slice %16 {offsets = [56, 0], sizes = [8, 32], strides = [1, 1]} : vector<80x32xf32> to vector<8x32xf32>
    %165 = vector.extract_strided_slice %16 {offsets = [56, 0], sizes = [8, 32], strides = [1, 1]} : vector<80x32xf32> to vector<8x32xf32>
    %166 = vector.extract_strided_slice %16 {offsets = [64, 0], sizes = [8, 32], strides = [1, 1]} : vector<80x32xf32> to vector<8x32xf32>
    %167 = vector.extract_strided_slice %16 {offsets = [64, 0], sizes = [8, 32], strides = [1, 1]} : vector<80x32xf32> to vector<8x32xf32>
    %168 = vector.extract_strided_slice %16 {offsets = [72, 0], sizes = [8, 32], strides = [1, 1]} : vector<80x32xf32> to vector<8x32xf32>
    %169 = tpu.concatenate %153, %154, %155, %156, %157, %158, %159, %160, %161, %162, %163, %164, %165, %166, %167, %168 in 1 : vector<8x32xf32>, vector<8x32xf32>, vector<8x32xf32>, vector<8x32xf32>, vector<8x32xf32>, vector<8x32xf32>, vector<8x32xf32>, vector<8x32xf32>, vector<8x32xf32>, vector<8x32xf32>, vector<8x32xf32>, vector<8x32xf32>, vector<8x32xf32>, vector<8x32xf32>, vector<8x32xf32>, vector<8x32xf32> -> vector<8x512xf32>
    %170 = tpu.concatenate %33, %50, %67, %84, %101, %118, %135, %152, %169 in 0 : vector<8x512xf32>, vector<8x512xf32>, vector<8x512xf32>, vector<8x512xf32>, vector<8x512xf32>, vector<8x512xf32>, vector<8x512xf32>, vector<8x512xf32>, vector<8x512xf32> -> vector<72x512xf32>
    %171 = arith.truncf %170 : vector<72x512xf32> to vector<72x512xbf16>
    %c0_11 = arith.constant 0 : index
    %c0_12 = arith.constant 0 : index
    %172 = vector.load %arg4[%c0_11, %c0_12] : memref<8x72xbf16, #tpu.memory_space<vmem>>, vector<8x72xbf16>
    %cst_13 = arith.constant dense<0.000000e+00> : vector<8x512xf32>
    %173 = tpu.matmul %172, %171, %cst_13 {dimension_numbers = #tpu.dot_dimension_numbers<[1], [0], [0], [1], [0, 0, 1, 1], [], []>} : vector<8x72xbf16>, vector<72x512xbf16>, vector<8x512xf32> -> vector<8x512xf32>
    %cst_14 = arith.constant dense<0.000000e+00> : vector<8xf32>
    %174 = vector.multi_reduction <add>, %173, %cst_14 [1] : vector<8x512xf32> to vector<8xf32>
    %175 = vector.shape_cast %174 : vector<8xf32> to vector<8x1xf32>
    %176 = arith.mulf %173, %173 : vector<8x512xf32>
    %cst_15 = arith.constant dense<0.000000e+00> : vector<8xf32>
    %177 = vector.multi_reduction <add>, %176, %cst_15 [1] : vector<8x512xf32> to vector<8xf32>
    %178 = vector.shape_cast %177 : vector<8xf32> to vector<8x1xf32>
    %c0_16 = arith.constant 0 : index
    %c0_17 = arith.constant 0 : index
    %c0_18 = arith.constant 0 : index
    %179 = vector.load %arg5[%c0_16, %c0_17, %c0_18] : memref<1x8x2xf32, #tpu.memory_space<vmem>>, vector<1x8x2xf32>
    %180 = vector.shape_cast %179 : vector<1x8x2xf32> to vector<8x2xf32>
    %181 = tpu.concatenate %175, %178 in 1 : vector<8x1xf32>, vector<8x1xf32> -> vector<8x2xf32>
    %182 = arith.addf %180, %181 : vector<8x2xf32>
    %c0_19 = arith.constant 0 : index
    %c0_20 = arith.constant 0 : index
    %c0_21 = arith.constant 0 : index
    %183 = vector.load %arg5[%c0_19, %c0_20, %c0_21] : memref<1x8x2xf32, #tpu.memory_space<vmem>>, vector<1x8x2xf32>
    %184 = vector.shape_cast %183 : vector<1x8x2xf32> to vector<8x2xf32>
    %185 = vector.shape_cast %182 : vector<8x2xf32> to vector<1x8x2xf32>
    tpu.vector_store %arg5[%c0_19, %c0_20, %c0_21], %185 {strides = array<i32>} : memref<1x8x2xf32, #tpu.memory_space<vmem>>, vector<1x8x2xf32>,
    return
  }
  func.func @transform_0(%arg0: i32, %arg1: i32) -> (i32, i32, i32) {
    %c0_i32 = arith.constant 0 : i32
    %c0_i32_0 = arith.constant 0 : i32
    %c0_i32_1 = arith.constant 0 : i32
    return %arg0, %c0_i32, %c0_i32_0 : i32, i32, i32
  }
  func.func @transform_1(%arg0: i32, %arg1: i32) -> (i32, i32, i32) {
    %c0_i32 = arith.constant 0 : i32
    %c0_i32_0 = arith.constant 0 : i32
    %c0_i32_1 = arith.constant 0 : i32
    %c0_i32_2 = arith.constant 0 : i32
    return %c0_i32, %c0_i32_0, %c0_i32_1 : i32, i32, i32
  }
  func.func @transform_2(%arg0: i32, %arg1: i32) -> (i32, i32) {
    %c0_i32 = arith.constant 0 : i32
    %c0_i32_0 = arith.constant 0 : i32
    %c0_i32_1 = arith.constant 0 : i32
    return %c0_i32, %c0_i32_0 : i32, i32
  }
  func.func @transform_3(%arg0: i32, %arg1: i32) -> (i32, i32, i32) {
    %c0_i32 = arith.constant 0 : i32
    %c0_i32_0 = arith.constant 0 : i32
    %c0_i32_1 = arith.constant 0 : i32
    return %arg0, %c0_i32, %c0_i32_0 : i32, i32, i32
  }
}

</mosaic_0001>

<bundles_post_ra>
// kernel: tpu_custom_call.1
= control target key start
LH: loop header
LB: loop body
LE: loop exit
PB: predicated region body
PF: predicated region fallthrough
CT: control target
= control target key end

     0   :  { %s1754_s12 = smov 0   ;;  %s1756_s13 = smov 0   ;;  %s2357_s0 = inlined_call_operand.vmem [shape: bf16[2,144,128], index: 0, kind: input, shape index: {}]   ;;  %s2358_s1 = inlined_call_operand.vmem [shape: bf16[3,128,32], index: 1, kind: input, shape index: {}]   ;;  %s2359_s2 = inlined_call_operand.vmem [shape: bf16[8,72], index: 2, kind: input, shape index: {}]   ;;  %s2360_s3 = inlined_call_operand.vmem [shape: f32[2,8,2], index: 3, kind: output, shape index: {}]  }
   0x1   :  { %s1758_s14 = smov 0   ;;  %s1760_s15 = smov 0  }
   0x2   :  { %s1762_s16 = smov 0  }
   0x3 LB: > { %s22_s17 = sadd.s32 1, %s1717_s14  ;;  %s25_s18 = sadd.s32 1, %s1721_s15  ;;  %s1725_s16 = sphi %s1762_s16, %s13_s16   ;;  %s1721_s15 = sphi %s1760_s15, %s2364_s15   ;;  %s1717_s14 = sphi %s1758_s14, %s2363_s14   ;;  %s1713_s13 = sphi %s1756_s13, %s2362_s13   ;;  %s1709_s12 = sphi %s1754_s12, %s2361_s12  }
   0x4   : > { %p23_p0 = scmp.ge.s32.totalorder %s22_s17, 2  ;;  %p1210_p1 = scmp.ge.s32.totalorder %s1725_s16, 1 }
   0x5   : > { %p149_p2 = scmp.lt.s32.totalorder %s1725_s16, 5 }
   0x6   : > { %s2366_s17 = smov (%p23_p0, %s22_s17), 0  ;;  %s2368_s18 = smov (!%p23_p0, %s25_s18), %s1721_s15 }
   0x7   : > { %p150_p3 = pnand %p1210_p1, %p149_p2  ;;  %p27_p4 = scmp.ge.s32.totalorder %s2368_s18, 2 }
   0x8   : > { %p172_p5 = scmp.lt.s32.totalorder (!%p150_p3), %s1713_s13, 1  ;;  %p1213_p6 = scmp.ne.s32.totalorder (!%p150_p3), %s1709_s12, 0 }
   0x9   : > { %s2370_s18 = smov (%p27_p4, %s2368_s18), 0  ;;  %153 = sbr.rel (%p150_p3) target bundleno = 812 (0x32c), region = 32 }
   0xe   : > { %s2372_s13 = smov (!%p172_p5, %s1713_s13), 1  ;;  %185 = sbr.rel (%p1213_p6) target bundleno = 21 (0x15), region = 36 }
   0xf   : > { %s1430_s19 = smul.u32 72, %s2372_s13  ;;  %s1212_s20 = sshll.u32 %s2372_s13, 3 }
  0x10   : > { %s1789_s23 = scalar_lea.vmem %s2360_s3, %s1212_s20 }
  0x11   : > { %s1794_s26 = scalar_lea.vmem %s2357_s0, %s1430_s19 }
  0x13   : > { %vm186_vm0 = vcmask 15360   ;;  %v1727_v0 = vmov 0.0  }
  0x14   : > { %187 = vst.msk [vmem:[%s1789_s23] sm:$0xff] %vm186_vm0, %v1727_v0 }
  0x15 PF: > { %v1658_v1 = vld [vmem:[%s2358_s1 + $0x38] sm:$0xff]   ;;  %v1728_v2 = vmov 0.0   ;;  %v1660_v4 = vld [vmem:[%s2358_s1 + $0x30] sm:$0xff]   ;;  %vm1729_vm1 = vmmov 0   ;;  %v1662_v6 = vld [vmem:[%s2358_s1 + $0x28] sm:$0xff]   ;;  %s1214_s10 = sshll.u32 %s1709_s12, 6 }
  0x16   : > { %1322 = vmatprep.subr.bf16.mxu0 %v1728_v2  ;;  %1358 = vmatprep.subr.bf16.mxu1 %v1728_v2  ;;  %v1659_v3 = vld [vmem:[%s2358_s1 + $0x78] sm:$0xff]   ;;  %v1661_v5 = vld [vmem:[%s2358_s1 + $0x70] sm:$0xff]   ;;  %v1663_v7 = vld [vmem:[%s2358_s1 + $0x68] sm:$0xff]   ;;  %s189_s19 = sshra.s32 %s1214_s10, 3  ;;  %s1731_s11 = smov 96   ;;  %vm690_vm2 = vcmask 261120  }
  0x17   : > { %1323 = vmatpush3.bf16.msra.mxu0 %v1658_v1  ;;  %1338 = vmatprep.mubr.msk.bf16.mxu0 %vm1729_vm1, %v1728_v2  ;;  %v1664_v8 = vld [vmem:[%s2358_s1 + $0x20] sm:$0xff]   ;;  %s1215_s24 = sshll.u32 %s189_s19, 2  ;;  %v1666_v10 = vld [vmem:[%s2358_s1 + $0x18] sm:$0xff]   ;;  %v1668_v12 = vld [vmem:[%s2358_s1 + $0x10] sm:$0xff]   ;;  %s1732_s13 = smov 64   ;;  %vm692_vm3 = vcmask 523264  }
  0x18   : > { %1359 = vmatpush3.bf16.msra.mxu1 %v1659_v3  ;;  %1324 = vmatprep.subr.bf16.mxu0 %v1728_v2  ;;  %v1665_v9 = vld [vmem:[%s2358_s1 + $0x60] sm:$0xff]   ;;  %v1667_v11 = vld [vmem:[%s2358_s1 + $0x58] sm:$0xff]   ;;  %s1843_s30 = scalar_lea.vmem %s1794_s26, %s1215_s24  ;;  %v1669_v13 = vld [vmem:[%s2358_s1 + $0x50] sm:$0xff]   ;;  %vm694_vm4 = vcmask 785408   ;;  %vm1025_vm5 = vcmask 1043456   ;;  %vm1021_vm6 = vcmask 588800  }
  0x19   : > { %1360 = vmatprep.subr.bf16.mxu1 %v1728_v2  ;;  %1374 = vmatprep.mubr.msk.bf16.mxu1 %vm1729_vm1, %v1728_v2  ;;  %v1670_v14 = vld [vmem:[%s2358_s1 + $0x8] sm:$0xff]   ;;  %v1672_v16 = vld [vmem:[%s2358_s1] sm:$0xff]   ;;  %v1676_v19 = vld [vmem:[%s2358_s1 + $0xb8] sm:$0xff]   ;;  %vm1135_vm7 = vcmask 7168   ;;  %vm1138_vm8 = vcmask 15360  }
  0x1a   : > { %v1671_v15 = vld [vmem:[%s2358_s1 + $0x48] sm:$0xff]   ;;  %v1673_v17 = vld [vmem:[%s2358_s1 + $0x40] sm:$0xff]   ;;  %v1677_v20 = vld [vmem:[%s2358_s1 + $0xb0] sm:$0xff]  }
  0x1b   : > { %1325 = vmatpush3.bf16.msra.mxu0 %v1660_v4  ;;  %v1674_v18 = vld [vmem:[%s1843_s30] sm:$0xff]   ;;  %v1675_v21 = vld [vmem:[%s1843_s30 + $0x8] sm:$0xff]   ;;  %v1678_v24 = vld [vmem:[%s1843_s30 + $0x10] sm:$0xff]  }
  0x1c   : > { %1361 = vmatpush3.bf16.msra.mxu1 %v1661_v5  ;;  %1326 = vmatprep.subr.bf16.mxu0 %v1728_v2  ;;  %v1679_v22 = vld [vmem:[%s2358_s1 + $0xa8] sm:$0xff]   ;;  %v1680_v23 = vld [vmem:[%s2358_s1 + $0xa0] sm:$0xff]   ;;  %v1682_v25 = vld [vmem:[%s2358_s1 + $0x98] sm:$0xff]  }
  0x1d   : > { %1362 = vmatprep.subr.bf16.mxu1 %v1728_v2  ;;  %v1683_v26 = vld [vmem:[%s2358_s1 + $0x90] sm:$0xff]   ;;  %v1681_v27 = vld [vmem:[%s1843_s30 + $0x18] sm:$0xff]   ;;  %v1685_v28 = vld [vmem:[%s2358_s1 + $0x88] sm:$0xff]  }
  0x1e   : > { %v1686_v29 = vld [vmem:[%s2358_s1 + $0x80] sm:$0xff]  }
  0x1f   : > { %1327 = vmatpush3.bf16.msra.mxu0 %v1662_v6  ;;  %v1684_v30 = vld [vmem:[%s1843_s30 + $0x20] sm:$0xff]   ;;  %s1730_s30 = smov 32  }
  0x20   : > { %1363 = vmatpush3.bf16.msra.mxu1 %v1663_v7  ;;  %1328 = vmatprep.subr.bf16.mxu0 %v1728_v2 }
  0x21   : > { %1364 = vmatprep.subr.bf16.mxu1 %v1728_v2 }
  0x23   : > { %1329 = vmatpush3.bf16.msra.mxu0 %v1664_v8 }
  0x24   : > { %1365 = vmatpush3.bf16.msra.mxu1 %v1665_v9  ;;  %1330 = vmatprep.subr.bf16.mxu0 %v1728_v2 }
  0x25   : > { %1366 = vmatprep.subr.bf16.mxu1 %v1728_v2 }
  0x27   : > { %1331 = vmatpush3.bf16.msra.mxu0 %v1666_v10 }
  0x28   : > { %1367 = vmatpush3.bf16.msra.mxu1 %v1667_v11  ;;  %1332 = vmatprep.subr.bf16.mxu0 %v1728_v2 }
  0x29   : > { %1368 = vmatprep.subr.bf16.mxu1 %v1728_v2 }
  0x2b   : > { %1333 = vmatpush3.bf16.msra.mxu0 %v1668_v12 }
  0x2c   : > { %1369 = vmatpush3.bf16.msra.mxu1 %v1669_v13  ;;  %1334 = vmatprep.subr.bf16.mxu0 %v1728_v2 }
  0x2d   : > { %1370 = vmatprep.subr.bf16.mxu1 %v1728_v2 }
  0x2f   : > { %1335 = vmatpush3.bf16.msra.mxu0 %v1670_v14 }
  0x30   : > { %1371 = vmatpush3.bf16.msra.mxu1 %v1671_v15  ;;  %1336 = vmatprep.subr.bf16.mxu0 %v1728_v2 }
  0x31   : > { %1372 = vmatprep.subr.bf16.mxu1 %v1728_v2 }
  0x33   : > { %1337 = vmatpush3.bf16.msra.mxu0 %v1672_v16 }
  0x34   : > { %1373 = vmatpush3.bf16.msra.mxu1 %v1673_v17  ;;  %1394 = vmatprep.subr.bf16.mxu0 %v1728_v2 }
  0x36   : > { %1339 = vmatmul.mubr.bf16.vlgmr.msra.gmra.mxu0 %v1674_v18 }
  0x37   : > { %1375 = vmatmul.mubr.bf16.vlgmr.msra.gmra.mxu1 %v1674_v18  ;;  %1342 = vmatprep.mubr.msk.bf16.mxu0 %vm1729_vm1, %v1728_v2 }
  0x38   : > { %1378 = vmatprep.mubr.msk.bf16.mxu1 %vm1729_vm1, %v1728_v2  ;;  %1395 = vmatpush3.bf16.msra.mxu0 %v1676_v19 }
  0x39   : > { %1396 = vmatprep.subr.bf16.mxu0 %v1728_v2 }
  0x3c   : > { %1397 = vmatpush3.bf16.msra.mxu0 %v1677_v20 }
  0x3d   : > { %1398 = vmatprep.subr.bf16.mxu0 %v1728_v2 }
  0x3e   : > { %1343 = vmatmul.mubr.bf16.gmra.mxu0 %v1675_v21 }
  0x3f   : > { %1379 = vmatmul.mubr.bf16.gmra.mxu1 %v1675_v21  ;;  %1346 = vmatprep.mubr.msk.bf16.mxu0 %vm1729_vm1, %v1728_v2 }
  0x40   : > { %1399 = vmatpush3.bf16.msra.mxu0 %v1679_v22  ;;  %1382 = vmatprep.mubr.msk.bf16.mxu1 %vm1729_vm1, %v1728_v2 }
  0x41   : > { %1400 = vmatprep.subr.bf16.mxu0 %v1728_v2 }
  0x44   : > { %1401 = vmatpush3.bf16.msra.mxu0 %v1680_v23 }
  0x45   : > { %1402 = vmatprep.subr.bf16.mxu0 %v1728_v2 }
  0x46   : > { %1347 = vmatmul.mubr.bf16.gmra.mxu0 %v1678_v24 }
  0x47   : > { %1383 = vmatmul.mubr.bf16.gmra.mxu1 %v1678_v24  ;;  %1350 = vmatprep.mubr.msk.bf16.mxu0 %vm1729_vm1, %v1728_v2 }
  0x48   : > { %1403 = vmatpush3.bf16.msra.mxu0 %v1682_v25  ;;  %1386 = vmatprep.mubr.msk.bf16.mxu1 %vm1729_vm1, %v1728_v2 }
  0x49   : > { %1404 = vmatprep.subr.bf16.mxu0 %v1728_v2 }
  0x4c   : > { %1405 = vmatpush3.bf16.msra.mxu0 %v1683_v26 }
  0x4d   : > { %1406 = vmatprep.subr.bf16.mxu0 %v1728_v2 }
  0x4e   : > { %1351 = vmatmul.mubr.bf16.gmra.mxu0 %v1681_v27 }
  0x4f   : > { %1387 = vmatmul.mubr.bf16.gmra.mxu1 %v1681_v27  ;;  %1354 = vmatprep.mubr.msk.bf16.mxu0 %vm1729_vm1, %v1728_v2 }
  0x50   : > { %1407 = vmatpush3.bf16.msra.mxu0 %v1685_v28  ;;  %1390 = vmatprep.mubr.msk.bf16.mxu1 %vm1729_vm1, %v1728_v2 }
  0x51   : > { %1408 = vmatprep.subr.bf16.mxu0 %v1728_v2 }
  0x54   : > { %1409 = vmatpush3.bf16.msra.mxu0 %v1686_v29 }
  0x56   : > { %1355 = vmatmul.mubr.bf16.gmra.mxu0 %v1684_v30 }
  0x57   : > { %1410 = vmatprep.mubr.msk.bf16.mxu0 %vm1729_vm1, %v1728_v2  ;;  %1391 = vmatmul.mubr.bf16.gmra.mxu1 %v1684_v30 }
  0x5e   : > { %1411 = vmatmul.mubr.bf16.vlgmr.msra.gmra.mxu0 %v1674_v18 }
  0x5f   : > { %1414 = vmatprep.mubr.msk.bf16.mxu0 %vm1729_vm1, %v1728_v2 }
  0x66   : > { %1415 = vmatmul.mubr.bf16.gmra.mxu0 %v1675_v21 }
  0x67   : > { %1418 = vmatprep.mubr.msk.bf16.mxu0 %vm1729_vm1, %v1728_v2 }
  0x6e   : > { %1419 = vmatmul.mubr.bf16.gmra.mxu0 %v1678_v24 }
  0x6f   : > { %1422 = vmatprep.mubr.msk.bf16.mxu0 %vm1729_vm1, %v1728_v2 }
  0x76   : > { %1423 = vmatmul.mubr.bf16.gmra.mxu0 %v1681_v27 }
  0x77   : > { %1426 = vmatprep.mubr.msk.bf16.mxu0 %vm1729_vm1, %v1728_v2 }
  0x7e   : > { %1427 = vmatmul.mubr.bf16.gmra.mxu0 %v1684_v30 }
  0xf6   : > { %v1933_v31 = vpop.f32.mrf.mxu0 }
  0xf7   : > { %v1935_v32 = vpop.f32.mrf.mxu1 }
  0xf8   : > { %v1340_v33 = vpop.f32.mrf.mxu0 }
  0xf9   : > { %v1376_v34 = vpop.f32.mrf.mxu1 }
  0xfa   : > { %v1937_v35 = vpop.f32.mrf.mxu0 }
  0xfb   : > { %v1939_v36 = vpop.f32.mrf.mxu1 }
  0xfc   : > { %v1341_v37 = vpop.f32.mrf.mxu0 }
  0xfd   : > { %v1377_v38 = vpop.f32.mrf.mxu1 }
  0xfe   : > { %v1941_v39 = vpop.f32.mrf.mxu0 }
  0xff   : > { %v1943_v40 = vpop.f32.mrf.mxu1  ;;  %v1483_v48 = vpack.i.bf16 %v1939_v36, %v1941_v39 }
 0x100   : > { %v1344_v41 = vpop.f32.mrf.mxu0  ;;  %v1478_v42 = vpack.i.bf16 %v1943_v40, %v1939_v36 }
 0x101   : > { %v1380_v43 = vpop.f32.mrf.mxu1 }
 0x102   : > { %1479 = vrot.lane.b32.xlu1 %v1478_v42, %s1730_s30  ;;  %v1948_v44 = vpop.f32.mrf.mxu0 }
 0x103   : > { %v1950_v45 = vpop.f32.mrf.mxu1  ;;  %v1498_v53 = vpack.i.bf16 %v1937_v35, %v1948_v44 }
 0x104   : > { %v1345_v46 = vpop.f32.mrf.mxu0  ;;  %v1488_v47 = vpack.i.bf16 %v1950_v45, %v1943_v40 }
 0x105   : > { %v1381_v49 = vpop.f32.mrf.mxu1 }
 0x106   : > { %1489 = vrot.lane.b32.xlu0 %v1488_v47, %s1731_s11  ;;  %1484 = vrot.lane.b32.xlu1 %v1483_v48, %s1732_s13  ;;  %v1958_v50 = vpop.f32.mrf.mxu0 }
 0x107   : > { %v1960_v51 = vpop.f32.mrf.mxu1  ;;  %v1513_v59 = vpack.i.bf16 %v1941_v39, %v1958_v50  ;;  %v1518_v6 = vpack.i.bf16 %v1950_v45, %v1958_v50 }
 0x108   : > { %v1348_v52 = vpop.f32.mrf.mxu0  ;;  %v1503_v56 = vpack.i.bf16 %v1960_v51, %v1950_v45  ;;  %v1508_v62 = vpack.i.bf16 %v1943_v40, %v1960_v51 }
 0x109   : > { %v1384_v54 = vpop.f32.mrf.mxu1 }
 0x10a   : > { %1499 = vrot.lane.b32.xlu0 %v1498_v53, %s1732_s13  ;;  %1494 = vrot.lane.b32.xlu1 %v1498_v53, %s1730_s30  ;;  %v1966_v55 = vpop.f32.mrf.mxu0 }
 0x10b   : > { %v1970_v57 = vpop.f32.mrf.mxu1  ;;  %v1533_v11 = vpack.i.bf16 %v1948_v44, %v1966_v55 }
 0x10c   : > { %v1349_v58 = vpop.f32.mrf.mxu0  ;;  %v1528_v3 = vpack.i.bf16 %v1970_v57, %v1960_v51 }
 0x10d   : > { %v1385_v60 = vpop.f32.mrf.mxu1 }
 0x10e   : > { %1504 = vrot.lane.b32.xlu0 %v1503_v56, %s1730_s30  ;;  %1514 = vrot.lane.b32.xlu1 %v1513_v59, %s1730_s30  ;;  %v1976_v61 = vpop.f32.mrf.mxu0 }
 0x10f   : > { %v1980_v63 = vpop.f32.mrf.mxu1 }
 0x110   : > { %v1352_v0 = vpop.f32.mrf.mxu0  ;;  %v1573_v41 = vpack.i.bf16 %v1980_v63, %v1970_v57 }
 0x111   : > { %v1388_v1 = vpop.f32.mrf.mxu1 }
 0x112   : > { %1509 = vrot.lane.b32.xlu0 %v1508_v62, %s1732_s13  ;;  %1524 = vrot.lane.b32.xlu1 %v1513_v59, %s1731_s11  ;;  %v1984_v2 = vpop.f32.mrf.mxu0  ;;  %v1733_v59 = vmov 0  }
 0x113   : > { %v1988_v4 = vpop.f32.mrf.mxu1  ;;  %1070 = vmatprep.mubr.bf16.mxu1 %v1733_v59 }
 0x114   : > { %v1353_v5 = vpop.f32.mrf.mxu0  ;;  %v1618_v1 = vpack.i.bf16 %v1988_v4, %v1980_v63 }
 0x115   : > { %v1389_v7 = vpop.f32.mrf.mxu1 }
 0x116   : > { %1519 = vrot.lane.b32.xlu0 %v1518_v6, %s1732_s13  ;;  %1529 = vrot.lane.b32.xlu1 %v1528_v3, %s1731_s11  ;;  %v1994_v8 = vpop.f32.mrf.mxu0  ;;  %v1633_v3 = vpack.i.bf16 %v1970_v57, %v1976_v61  ;;  %v1643_v7 = vpack.i.bf16 %v1966_v55, %v1984_v2 }
 0x117   : > { %v501_v9 = vpop.f32.mrf.mxu1  ;;  %v1623_v0 = vpack.i.bf16 %v1976_v61, %v1994_v8  ;;  %v1628_v5 = vpack.i.bf16 %v1988_v4, %v1994_v8 }
 0x118   : > { %v1356_v10 = vpop.f32.mrf.mxu0  ;;  %v1558_v38 = vpack.i.bf16 %v501_v9, %v1988_v4  ;;  %v1578_v46 = vpack.i.bf16 %v1980_v63, %v501_v9 }
 0x119   : > { %v1392_v12 = vpop.f32.mrf.mxu1 }
 0x11a   : > { %1534 = vrot.lane.b32.xlu0 %v1533_v11, %s1731_s11  ;;  %v1999_v13 = vpop.f32.mrf.mxu0 }
 0x11b   : > { %v504_v14 = vpop.f32.mrf.mxu1  ;;  %v1638_v6 = vpack.i.bf16 %v1984_v2, %v1999_v13 }
 0x11c   : > { %v1357_v15 = vpop.f32.mrf.mxu0  ;;  %v1583_v47 = vpack.i.bf16 %v504_v14, %v501_v9 }
 0x11d   : > { %v1393_v16 = vpop.f32.mrf.mxu1 }
 0x11e   : > { %v2001_v17 = vpop.f32.mrf.mxu0 }
 0x120   : > { %v1412_v18 = vpop.f32.mrf.mxu0 }
 0x122   : > { %v2003_v19 = vpop.f32.mrf.mxu0 }
 0x124   : > { %v1413_v20 = vpop.f32.mrf.mxu0 }
 0x126   : > { %v2005_v21 = vpop.f32.mrf.mxu0 }
 0x128   : > { %v1416_v22 = vpop.f32.mrf.mxu0 }
 0x12a   : > { %v2007_v23 = vpop.f32.mrf.mxu0 }
 0x12b   : > { %v1543_v24 = vpack.i.bf16 %v2003_v19, %v2007_v23 }
 0x12c   : > { %v1417_v25 = vpop.f32.mrf.mxu0 }
 0x12d   : > { %1544 = vrot.lane.b32.xlu0 %v1543_v24, %s1732_s13  ;;  %1539 = vrot.lane.b32.xlu1 %v1543_v24, %s1730_s30 }
 0x12e   : > { %v2013_v26 = vpop.f32.mrf.mxu0 }
 0x12f   : > { %v1563_v27 = vpack.i.bf16 %v2005_v21, %v2013_v26  ;;  %v1548_v28 = vpack.i.bf16 %v2013_v26, %v2005_v21 }
 0x130   : > { %v1420_v29 = vpop.f32.mrf.mxu0 }
 0x131   : > { %1564 = vrot.lane.b32.xlu1 %v1563_v27, %s1731_s11  ;;  %1549 = vrot.lane.b32.xlu0 %v1548_v28, %s1730_s30 }
 0x132   : > { %v2021_v30 = vpop.f32.mrf.mxu0 }
 0x133   : > { %v1568_v33 = vpack.i.bf16 %v2021_v30, %v2007_v23 }
 0x134   : > { %v1421_v34 = vpop.f32.mrf.mxu0 }
 0x135   : > { %1554 = vrot.lane.b32.xlu0 %v1548_v28, %s1732_s13  ;;  %1569 = vrot.lane.b32.xlu1 %v1568_v33, %s1731_s11 }
 0x136   : > { %v2027_v37 = vpop.f32.mrf.mxu0 }
 0x138   : > { %v1424_v42 = vpop.f32.mrf.mxu0 }
 0x139   : > { %1559 = vrot.lane.b32.xlu0 %v1558_v38, %s1730_s30  ;;  %1574 = vrot.lane.b32.xlu1 %v1573_v41, %s1730_s30 }
 0x13a   : > { %v2034_v43 = vpop.f32.mrf.mxu0 }
 0x13b   : > { %v1593_v52 = vpack.i.bf16 %v2021_v30, %v2034_v43 }
 0x13c   : > { %v1425_v48 = vpop.f32.mrf.mxu0 }
 0x13d   : > { %1579 = vrot.lane.b32.xlu0 %v1578_v46, %s1732_s13  ;;  %1584 = vrot.lane.b32.xlu1 %v1583_v47, %s1731_s11 }
 0x13e   : > { %v639_v49 = vpop.f32.mrf.mxu0 }
 0x13f   : > { %v1603_v56 = vpack.i.bf16 %v639_v49, %v2027_v37  ;;  %v1608_v60 = vpack.i.bf16 %v2027_v37, %v639_v49 }
 0x140   : > { %v1428_v53 = vpop.f32.mrf.mxu0 }
 0x141   : > { %1594 = vrot.lane.b32.xlu0 %v1593_v52, %s1732_s13  ;;  %1589 = vrot.lane.b32.xlu1 %v1593_v52, %s1730_s30 }
 0x142   : > { %v642_v54 = vpop.f32.mrf.mxu0 }
 0x143   : > { %v1613_v62 = vpack.i.bf16 %v642_v54, %v2034_v43 }
 0x144   : > { %v1429_v58 = vpop.f32.mrf.mxu0 }
 0x145   : > { %1604 = vrot.lane.b32.xlu1 %v1603_v56, %s1732_s13  ;;  %1599 = vrot.lane.b32.xlu0 %v1603_v56, %s1730_s30 }
 0x149   : > { %1609 = vrot.lane.b32.xlu1 %v1608_v60, %s1731_s11  ;;  %1614 = vrot.lane.b32.xlu0 %v1613_v62, %s1731_s11 }
 0x14d   : > { %1624 = vrot.lane.b32.xlu1 %v1623_v0, %s1730_s30  ;;  %1619 = vrot.lane.b32.xlu0 %v1618_v1, %s1731_s11 }
 0x151   : > { %1634 = vrot.lane.b32.xlu1 %v1633_v3, %s1732_s13  ;;  %1629 = vrot.lane.b32.xlu0 %v1628_v5, %s1732_s13 }
 0x155   : > { %1644 = vrot.lane.b32.xlu1 %v1643_v7, %s1730_s30  ;;  %1639 = vrot.lane.b32.xlu0 %v1638_v6, %s1731_s11 }
 0x159   : > { %1654 = vrot.lane.b32.xlu1 %v1623_v0, %s1731_s11  ;;  %1649 = vrot.lane.b32.xlu0 %v1643_v7, %s1732_s13 }
 0x174   : > { %v1480_v9 = vpop.permute.xlu1 %1479 }
 0x175   : > { %v1482_v20 = vunpack.i.h.bf16 %v1480_v9  ;;  %v1481_v22 = vunpack.i.l.bf16 %v1480_v9 }
 0x177   : > { %v871_v28 = vsel %vm690_vm2, %v1939_v36, %v1482_v20  ;;  %v810_v34 = vsel %vm690_vm2, %v1935_v32, %v1481_v22  ;;  %v834_v54 = vsel %vm690_vm2, %v1939_v36, %v1481_v22 }
 0x178   : > { %v2071_v8 = vpop.permute.xlu0 %1489  ;;  %v1485_v10 = vpop.permute.xlu1 %1484 }
 0x179   : > { %v1487_v29 = vunpack.i.h.bf16 %v1485_v10  ;;  %v1492_v32 = vunpack.i.h.bf16 %v2071_v8  ;;  %v1491_v56 = vunpack.i.l.bf16 %v2071_v8  ;;  %v1486_v58 = vunpack.i.l.bf16 %v1485_v10 }
 0x17c   : > { %v2073_v11 = vpop.permute.xlu0 %1499  ;;  %v1495_v12 = vpop.permute.xlu1 %1494 }
 0x17d   : > { %v1497_v24 = vunpack.i.h.bf16 %v1495_v12  ;;  %v1502_v38 = vunpack.i.h.bf16 %v2073_v11  ;;  %v1496_v42 = vunpack.i.l.bf16 %v1495_v12  ;;  %v1501_v60 = vunpack.i.l.bf16 %v2073_v11 }
 0x17f   : > { %v691_v41 = vsel %vm690_vm2, %v1933_v31, %v1497_v24  ;;  %v717_v48 = vsel %vm690_vm2, %v1937_v35, %v1497_v24  ;;  %v2103_v31 = vsel %vm692_vm3, %v810_v34, %v1487_v29  ;;  %v2111_v1 = vsel %vm690_vm2, %v1941_v39, %v1496_v42 }
 0x180   : > { %v1505_v14 = vpop.permute.xlu0 %1504  ;;  %v1515_v13 = vpop.permute.xlu1 %1514  ;;  %v2115_v36 = vsel %vm690_vm2, %v1948_v44, %v1496_v42  ;;  %v2118_v3 = vsel %vm692_vm3, %v691_v41, %v1502_v38  ;;  %v2121_v5 = vsel %vm692_vm3, %v717_v48, %v1486_v58 }
 0x181   : > { %v1517_v33 = vunpack.i.h.bf16 %v1515_v13  ;;  %v1507_v49 = vunpack.i.h.bf16 %v1505_v14  ;;  %v1506_v52 = vunpack.i.l.bf16 %v1505_v14  ;;  %v1516_v53 = vunpack.i.l.bf16 %v1515_v13 }
 0x183   : > { %v754_v62 = vsel %vm690_vm2, %v1937_v35, %v1517_v33  ;;  %v874_v7 = vsel %vm690_vm2, %v1950_v45, %v1507_v49  ;;  %v2129_v39 = vsel %vm690_vm2, %v1943_v40, %v1506_v52  ;;  %v837_v9 = vsel %vm690_vm2, %v1950_v45, %v1506_v52 }
 0x184   : > { %v2075_v15 = vpop.permute.xlu0 %1509  ;;  %v2077_v16 = vpop.permute.xlu1 %1524  ;;  %v2135_v10 = vsel %vm690_vm2, %v1948_v44, %v1516_v53  ;;  %v2138_v12 = vsel %vm692_vm3, %v754_v62, %v1486_v58 }
 0x185   : > { %v1512_v0 = vunpack.i.h.bf16 %v2075_v15  ;;  %v1511_v40 = vunpack.i.l.bf16 %v2075_v15  ;;  %v1527_v29 = vunpack.i.h.bf16 %v2077_v16 }
 0x187   : > { %v835_v22 = vsel %vm692_vm3, %v834_v54, %v1512_v0  ;;  %v872_v24 = vsel %vm692_vm3, %v871_v28, %v1512_v0 }
 0x188   : > { %v2079_v18 = vpop.permute.xlu0 %1519  ;;  %v2081_v25 = vpop.permute.xlu1 %1529 }
 0x189   : > { %v1521_v45 = vunpack.i.l.bf16 %v2079_v18  ;;  %v1532_v44 = vunpack.i.h.bf16 %v2081_v25 }
 0x18c   : > { %v2083_v27 = vpop.permute.xlu0 %1534 }
 0x19f   : > { %v2092_v46 = vpop.permute.xlu0 %1544  ;;  %v2094_v47 = vpop.permute.xlu1 %1539 }
 0x1a0   : > { %v1541_v14 = vunpack.i.l.bf16 %v2094_v47  ;;  %v1546_v33 = vunpack.i.l.bf16 %v2092_v46  ;;  %v1542_v34 = vunpack.i.h.bf16 %v2094_v47 }
 0x1a2   : > { %v930_v28 = vsel %vm690_vm2, %v2005_v21, %v1541_v14  ;;  %v954_v15 = vsel %vm690_vm2, %v2007_v23, %v1541_v14  ;;  %v951_v21 = vsel %vm690_vm2, %v2003_v19, %v1542_v34 }
 0x1a3   : > { %v2123_v6 = vpop.permute.xlu1 %1564  ;;  %v1550_v35 = vpop.permute.xlu0 %1549 }
 0x1a4   : > { %v1552_v13 = vunpack.i.h.bf16 %v1550_v35  ;;  %v1551_v20 = vunpack.i.l.bf16 %v1550_v35  ;;  %v1566_v47 = vunpack.i.l.bf16 %v2123_v6  ;;  %v1531_v35 = vunpack.i.l.bf16 %v2081_v25 }
 0x1a5   : > { %v927_v25 = vsel %vm690_vm2, %v2001_v17, %v1542_v34 }
 0x1a6   : > { %v991_v53 = vsel %vm690_vm2, %v2007_v23, %v1552_v13  ;;  %v988_v54 = vsel %vm690_vm2, %v2003_v19, %v1551_v20  ;;  %v1547_v20 = vunpack.i.h.bf16 %v2092_v46  ;;  %v1567_v19 = vunpack.i.h.bf16 %v2123_v6 }
 0x1a7   : > { %v1555_v38 = vpop.permute.xlu0 %1554  ;;  %v1570_v41 = vpop.permute.xlu1 %1569 }
 0x1a8   : > { %v1557_v42 = vunpack.i.h.bf16 %v1555_v38  ;;  %v1556_v48 = vunpack.i.l.bf16 %v1555_v38  ;;  %v1572_v49 = vunpack.i.h.bf16 %v1570_v41  ;;  %v1571_v52 = vunpack.i.l.bf16 %v1570_v41 }
 0x1aa   : > { %v955_v58 = vsel %vm692_vm3, %v954_v15, %v1557_v42  ;;  %v989_v62 = vsel %vm692_vm3, %v988_v54, %v1556_v48  ;;  %v992_v0 = vsel %vm692_vm3, %v991_v53, %v1557_v42  ;;  %v952_v41 = vsel %vm692_vm3, %v951_v21, %v1556_v48 }
 0x1ab   : > { %v993_v14 = vsel %vm694_vm4, %v992_v0, %v1572_v49  ;;  %v2165_v38 = vpop.permute.xlu0 %1559  ;;  %v2167_v23 = vpop.permute.xlu1 %1574  ;;  %v990_v13 = vsel %vm694_vm4, %v989_v62, %v1571_v52  ;;  %v956_v42 = vsel %vm694_vm4, %v955_v58, %v1566_v47  ;;  %v931_v49 = vsel %vm692_vm3, %v930_v28, %v1546_v33 }
 0x1ac   : > { %v1017_v15 = vpack.c.bf16 %v993_v14, %v993_v14  ;;  %v1016_v53 = vpack.c.bf16 %v990_v13, %v990_v13  ;;  %v838_v54 = vsel %vm692_vm3, %v837_v9, %v1511_v40  ;;  %v875_v0 = vsel %vm692_vm3, %v874_v7, %v1511_v40 }
 0x1ad   : > { %v1522_v52 = vunpack.i.h.bf16 %v2079_v18  ;;  %v932_v46 = vsel %vm694_vm4, %v931_v49, %v1566_v47  ;;  %v953_v34 = vsel %vm694_vm4, %v952_v41, %v1567_v19  ;;  %v876_v33 = vsel %vm694_vm4, %v875_v0, %v1532_v44 }
 0x1ae   : > { %1277 = vmatprep.subr.msk.bf16.mxu1 %vm1025_vm5, %v1017_v15  ;;  %v1027_v17 = vsel %vm1025_vm5, %v1016_v53, 0  ;;  %v1013_v6 = vpack.c.bf16 %v956_v42, %v932_v46  ;;  %v1537_v9 = vunpack.i.h.bf16 %v2083_v27  ;;  %v1536_v7 = vunpack.i.l.bf16 %v2083_v27 }
 0x1af   : > { %v2182_v48 = vpop.permute.xlu0 %1579  ;;  %v2184_v58 = vpop.permute.xlu1 %1584  ;;  %v928_v18 = vsel %vm692_vm3, %v927_v25, %v1547_v20  ;;  %1045 = vmatpush1.bf16.msra.mxu1 %v1027_v17  ;;  %v839_v40 = vsel %vm694_vm4, %v838_v54, %v1531_v35  ;;  %v2195_v28 = vsel %vm694_vm4, %v2118_v3, %v1527_v29  ;;  %v1526_v47 = vunpack.i.l.bf16 %v2077_v16 }
 0x1b0   : > { %v721_v62 = vsel %vm692_vm3, %v2115_v36, %v1521_v45  ;;  %v929_v44 = vsel %vm694_vm4, %v928_v18, %v1567_v19  ;;  %1046 = vmatprep.subr.bf16.mxu1 %v1013_v6  ;;  %v2203_v27 = vsel %vm694_vm4, %v2121_v5, %v1527_v29  ;;  %v836_v14 = vsel %vm694_vm4, %v835_v22, %v1491_v56 }
 0x1b1   : > { %v1012_v21 = vpack.c.bf16 %v953_v34, %v929_v44  ;;  %v873_v3 = vsel %vm694_vm4, %v872_v24, %v1492_v32  ;;  %v814_v16 = vsel %vm692_vm3, %v2129_v39, %v1522_v52  ;;  %v758_v36 = vsel %vm692_vm3, %v2135_v10, %v1521_v45 }
 0x1b2   : > { %v1562_v13 = vunpack.i.h.bf16 %v2165_v38  ;;  %v1009_v29 = vpack.c.bf16 %v876_v33, %v839_v40  ;;  %v756_v22 = vsel %vm694_vm4, %v2138_v12, %v1537_v9  ;;  %v1561_v41 = vunpack.i.l.bf16 %v2165_v38 }
 0x1b3   : > { %v2216_v20 = vpop.permute.xlu0 %1594  ;;  %v2218_v5 = vpop.permute.xlu1 %1589  ;;  %1047 = vmatpush1.bf16.msra.mxu1 %v1012_v21  ;;  %v759_v32 = vsel %vm694_vm4, %v758_v36, %v1536_v7  ;;  %v722_v39 = vsel %vm694_vm4, %v721_v62, %v1526_v47  ;;  %v1000_v10 = vpack.c.bf16 %v2203_v27, %v2195_v28  ;;  %v812_v24 = vsel %vm694_vm4, %v2103_v31, %v1491_v56 }
 0x1b4   : > { %v1577_v45 = vunpack.i.h.bf16 %v2167_v23  ;;  %1048 = vmatprep.subr.bf16.mxu1 %v1009_v29  ;;  %v697_v12 = vsel %vm692_vm3, %v2111_v1, %v1501_v60  ;;  %v1576_v38 = vunpack.i.l.bf16 %v2167_v23  ;;  %v1008_v15 = vpack.c.bf16 %v873_v3, %v836_v14 }
 0x1b5   : > { %v815_v42 = vsel %vm694_vm4, %v814_v16, %v1531_v35  ;;  %v698_v25 = vsel %vm694_vm4, %v697_v12, %v1526_v47  ;;  %v1004_v19 = vpack.c.bf16 %v812_v24, %v756_v22  ;;  %v880_v8 = vsel %vm690_vm2, %v1988_v4, %v1562_v13 }
 0x1b6   : > { %v1005_v53 = vpack.c.bf16 %v815_v42, %v759_v32  ;;  %v1001_v49 = vpack.c.bf16 %v722_v39, %v698_v25  ;;  %v2243_v11 = vsel %vm690_vm2, %v1980_v63, %v1561_v41  ;;  %v1591_v60 = vunpack.i.l.bf16 %v2218_v5 }
 0x1b7   : > { %v1605_v56 = vpop.permute.xlu1 %1604  ;;  %v1600_v31 = vpop.permute.xlu0 %1599  ;;  %1049 = vmatpush1.bf16.msra.mxu1 %v1008_v15  ;;  %v843_v35 = vsel %vm690_vm2, %v1988_v4, %v1561_v41  ;;  %v2250_v54 = vsel %vm690_vm2, %v1970_v57, %v1577_v45  ;;  %v2254_v63 = vsel %vm690_vm2, %v1960_v51, %v1576_v38  ;;  %v1592_v46 = vunpack.i.h.bf16 %v2218_v5 }
 0x1b8   : > { %v1602_v1 = vunpack.i.h.bf16 %v1600_v31  ;;  %v1601_v23 = vunpack.i.l.bf16 %v1600_v31  ;;  %v1607_v0 = vunpack.i.h.bf16 %v1605_v56  ;;  %v1606_v52 = vunpack.i.l.bf16 %v1605_v56  ;;  %1050 = vmatprep.subr.bf16.mxu1 %v1005_v53 }
 0x1b9   : > { %v840_v4 = vsel %vm690_vm2, %v1970_v57, %v1576_v38  ;;  %v1582_v34 = vunpack.i.h.bf16 %v2182_v48  ;;  %v1581_v33 = vunpack.i.l.bf16 %v2182_v48  ;;  %v1596_v9 = vunpack.i.l.bf16 %v2216_v20 }
 0x1ba   : > { %v997_v17 = vsel %vm690_vm2, %v2034_v43, %v1602_v1  ;;  %v994_v6 = vsel %vm690_vm2, %v2021_v30, %v1601_v23  ;;  %v936_v18 = vsel %vm690_vm2, %v2027_v37, %v1591_v60  ;;  %v1587_v62 = vunpack.i.h.bf16 %v2184_v58 }
 0x1bb   : > { %v1610_v7 = vpop.permute.xlu1 %1609  ;;  %v1615_v51 = vpop.permute.xlu0 %1614  ;;  %1051 = vmatpush1.bf16.msra.mxu1 %v1004_v19  ;;  %v1597_v44 = vunpack.i.h.bf16 %v2216_v20  ;;  %v998_v57 = vsel %vm692_vm3, %v997_v17, %v1607_v0  ;;  %v995_v48 = vsel %vm692_vm3, %v994_v6, %v1606_v52  ;;  %v933_v27 = vsel %vm690_vm2, %v2013_v26, %v1592_v46 }
 0x1bc   : > { %v1611_v40 = vunpack.i.l.bf16 %v1610_v7  ;;  %v1617_v28 = vunpack.i.h.bf16 %v1615_v51  ;;  %v1616_v47 = vunpack.i.l.bf16 %v1615_v51  ;;  %1052 = vmatprep.subr.bf16.mxu1 %v1001_v49  ;;  %v960_v21 = vsel %vm690_vm2, %v2034_v43, %v1591_v60  ;;  %v2285_v43 = vld [vmem:[%s2359_s2] sm:$0xf] }
 0x1bd   : > { %v1612_v3 = vunpack.i.h.bf16 %v1610_v7  ;;  %v937_v5 = vsel %vm692_vm3, %v936_v18, %v1596_v9  ;;  %v844_v29 = vsel %vm692_vm3, %v843_v35, %v1581_v33  ;;  %v1586_v22 = vunpack.i.l.bf16 %v2184_v58 }
 0x1be   : > { %v999_v37 = vsel %vm694_vm4, %v998_v57, %v1617_v28  ;;  %v996_v14 = vsel %vm694_vm4, %v995_v48, %v1616_v47  ;;  %v961_v26 = vsel %vm692_vm3, %v960_v21, %v1607_v0  ;;  %v938_v41 = vsel %vm694_vm4, %v937_v5, %v1611_v40 }
 0x1bf   : > { %v1019_v16 = vpack.c.bf16 %v999_v37, %v999_v37  ;;  %v1625_v36 = vpop.permute.xlu1 %1624  ;;  %v1620_v13 = vpop.permute.xlu0 %1619  ;;  %v1018_v20 = vpack.c.bf16 %v996_v14, %v996_v14  ;;  %1053 = vmatpush1.bf16.msra.mxu1 %v1000_v10  ;;  %v881_v32 = vsel %vm692_vm3, %v880_v8, %v1581_v33  ;;  %v957_v39 = vsel %vm690_vm2, %v2021_v30, %v1592_v46 }
 0x1c0   : > { %v962_v58 = vsel %vm694_vm4, %v961_v26, %v1611_v40  ;;  %v958_v10 = vsel %vm692_vm3, %v957_v39, %v1606_v52  ;;  %v934_v45 = vsel %vm692_vm3, %v933_v27, %v1597_v44  ;;  %v1622_v12 = vunpack.i.h.bf16 %v1620_v13 }
 0x1c1   : > { %1279 = vmatprep.subr.msk.bf16.mxu1 %vm1025_vm5, %v1019_v16  ;;  %v1033_v24 = vsel %vm1025_vm5, %v1018_v20, 0  ;;  %v1621_v38 = vunpack.i.l.bf16 %v1620_v13  ;;  %v935_v15 = vsel %vm694_vm4, %v934_v45, %v1612_v3  ;;  %v959_v42 = vsel %vm694_vm4, %v958_v10, %v1612_v3 }
 0x1c2   : > { %v1627_v25 = vunpack.i.h.bf16 %v1625_v36  ;;  %1278 = vmatmul.mubr.msk.bf16.vlgmr.msra.gmra.mxu1 %vm1021_vm6, %v2285_v43  ;;  %v1015_v8 = vpack.c.bf16 %v962_v58, %v938_v41  ;;  %v845_v53 = vsel %vm694_vm4, %v844_v29, %v1586_v22  ;;  %v882_v49 = vsel %vm694_vm4, %v881_v32, %v1587_v62 }
 0x1c3   : > { %v1635_v30 = vpop.permute.xlu1 %1634  ;;  %v1630_v19 = vpop.permute.xlu0 %1629  ;;  %1086 = vmatpush1.bf16.msra.mxu1 %v1033_v24  ;;  %1111 = vmatprep.mubr.bf16.mxu1 %v1733_v59  ;;  %v841_v60 = vsel %vm692_vm3, %v840_v4, %v1582_v34  ;;  %v878_v1 = vsel %vm692_vm3, %v2250_v54, %v1582_v34  ;;  %v1626_v23 = vunpack.i.l.bf16 %v1625_v36  ;;  %v1014_v0 = vpack.c.bf16 %v959_v42, %v935_v15 }
 0x1c4   : > { %v1637_v56 = vunpack.i.h.bf16 %v1635_v30  ;;  %v1632_v31 = vunpack.i.h.bf16 %v1630_v19  ;;  %v1636_v35 = vunpack.i.l.bf16 %v1635_v30  ;;  %1087 = vmatprep.subr.bf16.mxu1 %v1015_v8  ;;  %v879_v52 = vsel %vm694_vm4, %v878_v1, %v1622_v12 }
 0x1c5   : > { %v842_v46 = vsel %vm694_vm4, %v841_v60, %v1621_v38  ;;  %v1631_v17 = vunpack.i.l.bf16 %v1630_v19  ;;  %v760_v6 = vsel %vm690_vm2, %v1966_v55, %v1627_v25  ;;  %v1011_v34 = vpack.c.bf16 %v882_v49, %v845_v53 }
 0x1c6   : > { %v817_v59 = vsel %vm692_vm3, %v2254_v63, %v1637_v56  ;;  %v820_v4 = vsel %vm692_vm3, %v2243_v11, %v1632_v31  ;;  %v763_v40 = vsel %vm690_vm2, %v1984_v2, %v1626_v23  ;;  %v1010_v28 = vpack.c.bf16 %v879_v52, %v842_v46  ;;  %v1134_v23 = vld [vmem:[%s1789_s23] sm:$0xff] }
 0x1c7   : > { %v1645_v33 = vpop.permute.xlu1 %1644  ;;  %v1640_v54 = vpop.permute.xlu0 %1639  ;;  %1088 = vmatpush1.bf16.msra.mxu1 %v1014_v0  ;;  %v761_v47 = vsel %vm692_vm3, %v760_v6, %v1636_v35  ;;  %v764_v63 = vsel %vm692_vm3, %v763_v40, %v1631_v17  ;;  %v818_v44 = vsel %vm694_vm4, %v817_v59, %v1621_v38  ;;  %v821_v14 = vsel %vm694_vm4, %v820_v4, %v1586_v22 }
 0x1c8   : > { %v1647_v9 = vunpack.i.h.bf16 %v1645_v33  ;;  %v1646_v7 = vunpack.i.l.bf16 %v1645_v33  ;;  %v1642_v51 = vunpack.i.h.bf16 %v1640_v54  ;;  %v1641_v18 = vunpack.i.l.bf16 %v1640_v54  ;;  %1089 = vmatprep.subr.bf16.mxu1 %v1011_v34 }
 0x1ca   : > { %v723_v11 = vsel %vm690_vm2, %v1966_v55, %v1647_v9  ;;  %v726_v62 = vsel %vm690_vm2, %v1984_v2, %v1646_v7  ;;  %v699_v57 = vsel %vm690_vm2, %v1958_v50, %v1647_v9  ;;  %v762_v48 = vsel %vm694_vm4, %v761_v47, %v1642_v51 }
 0x1cb   : > { %v1655_v27 = vpop.permute.xlu1 %1654  ;;  %v1650_v21 = vpop.permute.xlu0 %1649  ;;  %v765_v37 = vsel %vm694_vm4, %v764_v63, %v1641_v18  ;;  %v702_v3 = vsel %vm690_vm2, %v1976_v61, %v1646_v7  ;;  %1090 = vmatpush1.bf16.msra.mxu1 %v1010_v28  ;;  %v724_v2 = vsel %vm692_vm3, %v723_v11, %v1636_v35  ;;  %v727_v50 = vsel %vm692_vm3, %v726_v62, %v1631_v17 }
 0x1cc   : > { %v1657_v55 = vunpack.i.h.bf16 %v1655_v27  ;;  %v1656_v16 = vunpack.i.l.bf16 %v1655_v27  ;;  %v1652_v36 = vunpack.i.h.bf16 %v1650_v21  ;;  %v1651_v13 = vunpack.i.l.bf16 %v1650_v21 }
 0x1cd   : > { %v1007_v20 = vpack.c.bf16 %v821_v14, %v765_v37  ;;  %v1006_v5 = vpack.c.bf16 %v818_v44, %v762_v48 }
 0x1ce   : > { %v725_v29 = vsel %vm694_vm4, %v724_v2, %v1657_v55  ;;  %v700_v26 = vsel %vm692_vm3, %v699_v57, %v1652_v36  ;;  %v728_v22 = vsel %vm694_vm4, %v727_v50, %v1656_v16  ;;  %v703_v41 = vsel %vm692_vm3, %v702_v3, %v1651_v13 }
 0x1cf   : > { %1091 = vmatprep.subr.bf16.mxu1 %v1007_v20  ;;  %v701_v61 = vsel %vm694_vm4, %v700_v26, %v1657_v55  ;;  %v704_v32 = vsel %vm694_vm4, %v703_v41, %v1656_v16 }
 0x1d0   : > { %1092 = vmatpush1.bf16.msra.mxu1 %v1006_v5  ;;  %v1002_v39 = vpack.c.bf16 %v725_v29, %v701_v61  ;;  %v1003_v24 = vpack.c.bf16 %v728_v22, %v704_v32 }
 0x1d2   : > { %1093 = vmatprep.subr.bf16.mxu1 %v1003_v24 }
 0x1d4   : > { %1094 = vmatpush1.bf16.msra.mxu1 %v1002_v39 }
 0x1d7   : > { %1280 = vmatmul.mubr.msk.bf16.vlgmr.msra.gmra.mxu1 %vm1021_vm6, %v2285_v43 }
 0x282   : > { %v1072_v58 = vpop.f32.mrf.mxu1 }
 0x283   : > { %v1125_v38 = vmul.f32 %v1072_v58, %v1072_v58 }
 0x284   : > { %v1074_v10 = vpop.f32.mrf.mxu1 }
 0x285   : > { %v1126_v15 = vmul.f32 %v1074_v10, %v1074_v10  ;;  %v1120_v42 = vadd.f32 %v1074_v10, %v1072_v58 }
 0x286   : > { %v1076_v45 = vpop.f32.mrf.mxu1 }
 0x287   : > { %v1129_v30 = vadd.f32 %v1126_v15, %v1125_v38 }
 0x288   : > { %v1077_v12 = vpop.f32.mrf.mxu1 }
 0x297   : > { %v1113_v25 = vpop.f32.mrf.mxu1 }
 0x298   : > { %v1121_v19 = vadd.f32 %v1120_v42, %v1113_v25  ;;  %v1127_v8 = vmul.f32 %v1113_v25, %v1113_v25 }
 0x299   : > { %v1115_v56 = vpop.f32.mrf.mxu1 }
 0x29a   : > { %v1128_v31 = vmul.f32 %v1115_v56, %v1115_v56  ;;  %v1130_v53 = vadd.f32 %v1129_v30, %v1127_v8  ;;  %v1122_v49 = vadd.f32 %v1121_v19, %v1115_v56 }
 0x29b   : > { %v1117_v60 = vpop.f32.mrf.mxu1 }
 0x29c   : > { %v1131_v1 = vadd.f32 %v1130_v53, %v1128_v31  ;;  %1123 = vadd.xlane.f32.xlu0 %v1122_v49 }
 0x29d   : > { %v1118_v43 = vpop.f32.mrf.mxu1 }
 0x29e   : > { %1132 = vadd.xlane.f32.xlu1 %v1131_v1 }
 0x325   : > { %v1124_v0 = vpop.xlane.xlu0 %1123 }
 0x327   : > { %v1133_v35 = vpop.xlane.xlu1 %1132 }
 0x328   : > { %v1136_v52 = vsel %vm1135_vm7, %v1124_v0, %v1133_v35 }
 0x329   : > { %v1137_v46 = vadd.f32 %v1136_v52, %v1134_v23 }
 0x32b   : > { %1139 = vst.msk [vmem:[%s1789_s23] sm:$0xff] %vm1138_vm8, %v1137_v46 }
 0x32c PF: > { %s13_s16 = sadd.s32 1, %s1725_s16   ;;  %s2361_s12 = smov %s1717_s14 }
 0x32d   : > { %p10_p7 = scmp.ge.s32.totalorder %s13_s16, 6   ;;  %s2362_s13 = smov %s1721_s15 }
 0x32e   : > { %s2363_s14 = smov %s2366_s17  ;;  %s2364_s15 = smov %s2370_s18 }
 0x32f   :  { %12 = sbr.rel (!%p10_p7) target bundleno = 3 (0x3), region = 69 }

</bundles_post_ra>
